<compile_context>
chip_gen: v5e
topology: v5e:2x2
jax: 0.10.0
libtpu: 0.0.40
codegen_flags: <defaults>
</compile_context>

<pallas_src>
import numpy as np
import jax
import jax.numpy as jnp
from jax import lax
from jax.experimental import pallas as pl
from jax.experimental.pallas import tpu as pltpu

# ----------------------------- configuration -------------------------------
GNN_LAYERS = 3
IN_DIM = 8
NUM_HIDDEN = [16, 16, 4]
HEADS = [2, 2, 2]
NEG_SLOPE = 0.2
GRID_WIDTH = 4
BATCH_GRAPHS = 2
N_PER_GRAPH = GRID_WIDTH * GRID_WIDTH
N_NODES = BATCH_GRAPHS * N_PER_GRAPH
NUM_CHANNELS = NUM_HIDDEN[-1]

KSIZE, STRIDE, PAD = 7, 3, 2
IMAGE_WIDTH = (GRID_WIDTH - 1) * STRIDE - 2 * PAD + KSIZE    # 12
IMG_PIX = IMAGE_WIDTH * IMAGE_WIDTH                          # 144

MASK_NEG = -1e9   # additive mask; exp(mask - rowmax) underflows to exactly 0

# -------------------------- packed-slab row layout ---------------------------
HD = [HEADS[l] * NUM_HIDDEN[l] for l in range(GNN_LAYERS)]   # [32, 32, 8]
LAYER_IN = [IN_DIM, HD[0], HD[1]]                            # [8, 32, 32]
RES_W = [0, HD[1], HD[2]]                                    # [0, 32, 8]
WF_COLS = [HD[l] + RES_W[l] + 2 * HEADS[l] for l in range(GNN_LAYERS)]  # [36,68,20]

W0_R0 = 0                      # Wfull layer 0 : 8 rows
B0_R0 = W0_R0 + 8              # bias layer 0  : 1 row (8-row block)
W1_R0 = B0_R0 + 8              # Wfull layer 1 : 32 rows
B1_R0 = W1_R0 + 32
W2_R0 = B1_R0 + 8              # Wfull layer 2 : 32 rows
B2_R0 = W2_R0 + 32
GSEL_R0 = B2_R0 + 8            # graph selector: 2 rows
CB_R0 = GSEL_R0 + 8            # conv bias     : 1 row, col 0
MT_R0 = CB_R0 + 8              # deconv maps   : C * N_NODES rows, 144 cols
SLAB_ROWS = MT_R0 + NUM_CHANNELS * N_NODES                   # 240
SLAB_COLS = IMG_PIX                                          # 144


def _sigmoid(x):
    return 1.0 / (1.0 + jnp.exp(-x))


def _elu(x):
    return jnp.where(x > 0, x, jnp.exp(jnp.minimum(x, 0.0)) - 1.0)


# ------------------------------ fused kernel -------------------------------
def _fused_kernel(x_ref, maskb_ref, slab_ref, o_ref):
    maskb = maskb_ref[...]                                   # (N, N) additive mask

    def gat_layer(h, w_r0, w_rows, w_cols, b_r0, heads, dim, res_dim, act):
        hd = heads * dim
        # z | residual | el | er in ONE matmul (attn vectors folded into Wfull).
        wfull = slab_ref[w_r0:w_r0 + w_rows, 0:w_cols]       # (in, hd+res+2H)
        zr = jnp.dot(h, wfull, preferred_element_type=jnp.float32)
        z = zr[:, 0:hd]                                      # (N, hd)
        off_e = hd + res_dim

        rs, sums = [], []
        for hh in range(heads):
            el = zr[:, off_e + hh:off_e + hh + 1]            # (N, 1) source term
            er = zr[:, off_e + heads + hh:off_e + heads + hh + 1]   # (N, 1) dest
            e = er + el.T                                    # e[v, u]
            e = jnp.where(e >= 0.0, e, NEG_SLOPE * e) + maskb
            m = jnp.max(e, axis=1, keepdims=True)
            p = jnp.exp(e - m)                               # masked -> exact 0
            sums.append(jnp.sum(p, axis=1, keepdims=True))   # >= 1 (self loops)
            rs.append(jnp.dot(p, z, preferred_element_type=jnp.float32))  # (N,hd)

        # combine heads: cols [h*dim:(h+1)*dim] come from head h (iota/where,
        # no partial stores, no column concatenation).
        col = lax.broadcasted_iota(jnp.int32, (N_NODES, hd), 1)
        num = rs[heads - 1]
        den = sums[heads - 1]
        for hh in range(heads - 2, -1, -1):
            sel = col < (hh + 1) * dim
            num = jnp.where(sel, rs[hh], num)
            den = jnp.where(sel, sums[hh], den)

        rst = num * pl.reciprocal(den, approx=True)          # deferred softmax norm
        if res_dim:
            rst = rst + zr[:, hd:hd + res_dim]               # residual (packed)
        bias = slab_ref[b_r0:b_r0 + 1, 0:hd]                 # (1, hd)
        return act(rst + bias)                               # single packed act

    h0 = x_ref[...]
    h1 = gat_layer(h0, W0_R0, LAYER_IN[0], WF_COLS[0], B0_R0,
                   HEADS[0], NUM_HIDDEN[0], RES_W[0], _elu)
    h2 = gat_layer(h1, W1_R0, LAYER_IN[1], WF_COLS[1], B1_R0,
                   HEADS[1], NUM_HIDDEN[1], RES_W[1], _elu)
    h3 = gat_layer(h2, W2_R0, LAYER_IN[2], WF_COLS[2], B2_R0,
                   HEADS[2], NUM_HIDDEN[2], RES_W[2], _sigmoid)

    # head-sum (the 1/H mean is folded into the deconv maps)
    lg = h3[:, 0:NUM_CHANNELS] + h3[:, NUM_CHANNELS:2 * NUM_CHANNELS]   # (N, C)

    # ConvTranspose2d(C,1,7,3,2): per-node pixel contributions via C broadcast
    # multiply-adds, then one graph-sum matmul, one bias add, one sigmoid,
    # one (2, 144) store.
    contrib = lg[:, 0:1] * slab_ref[MT_R0:MT_R0 + N_NODES, :]
    for c in range(1, NUM_CHANNELS):
        mt_c = slab_ref[MT_R0 + c * N_NODES:MT_R0 + (c + 1) * N_NODES, :]
        contrib = contrib + lg[:, c:c + 1] * mt_c            # (N, 144)
    gsel = slab_ref[GSEL_R0:GSEL_R0 + BATCH_GRAPHS, 0:N_NODES]   # (2, N)
    cb = slab_ref[CB_R0:CB_R0 + 1, 0:1]                      # (1, 1)
    img = jnp.dot(gsel, contrib, preferred_element_type=jnp.float32) + cb
    o_ref[...] = _sigmoid(img)


# ------------------------------ host wrapper -------------------------------
def gat_mc_forward(x, maskb, slab):
    def vm(shape):
        nd = len(shape)
        return pl.BlockSpec(shape, lambda i, _nd=nd: (0,) * _nd)

    out = pl.pallas_call(
        _fused_kernel,
        out_shape=jax.ShapeDtypeStruct((BATCH_GRAPHS, IMG_PIX), jnp.float32),
        grid=(1,),
        in_specs=[vm(x.shape), vm(maskb.shape), vm(slab.shape)],
        out_specs=vm((BATCH_GRAPHS, IMG_PIX)),
        compiler_params=pltpu.CompilerParams(
            dimension_semantics=("arbitrary",)),
    )(x, maskb, slab)
    return out.reshape(BATCH_GRAPHS, IMAGE_WIDTH, IMAGE_WIDTH)


# ------------------------ parameter / constant prep -------------------------
def _perm_q(h_count, d_count):
    # column j of permute(0,2,1).flatten(1) output == column q[j] of the raw
    # head-major (h*D + d) layer output:  q[d*H + h] = h*D + d
    q = np.empty(h_count * d_count, dtype=np.int64)
    for d in range(d_count):
        for h in range(h_count):
            q[d * h_count + h] = h * d_count + d
    return q


def _attn_fold(al, ar, h_count, d_count):
    # A (H*D, 2H): z @ A == [el_all | er_all]; folded into Wfull so el/er come
    # out of the same matmul as z.
    hd = h_count * d_count
    a = np.zeros((hd, 2 * h_count), np.float32)
    alf = np.asarray(al, np.float32).reshape(-1)
    arf = np.asarray(ar, np.float32).reshape(-1)
    for h in range(h_count):
        a[h * d_count:(h + 1) * d_count, h] = alf[h * d_count:(h + 1) * d_count]
        a[h * d_count:(h + 1) * d_count, h_count + h] = arf[h * d_count:(h + 1) * d_count]
    return a


def prepare_inputs(raw_params, conv_w, conv_b, adj):
    p0, p1, p2 = raw_params

    # fold the inter-layer permutation into the NEXT layer's weight rows
    q01 = _perm_q(HEADS[0], NUM_HIDDEN[0]); qinv01 = np.argsort(q01)
    q12 = _perm_q(HEADS[1], NUM_HIDDEN[1]); qinv12 = np.argsort(q12)

    slab = np.zeros((SLAB_ROWS, SLAB_COLS), np.float32)

    # layer 0: no residual
    w0 = np.asarray(p0['w'], np.float32)                              # (8, 32)
    a0 = _attn_fold(p0['al'], p0['ar'], HEADS[0], NUM_HIDDEN[0])
    wf0 = np.concatenate([w0, w0 @ a0], axis=1)                       # (8, 36)
    slab[W0_R0:W0_R0 + LAYER_IN[0], :wf0.shape[1]] = wf0
    slab[B0_R0, :HD[0]] = np.asarray(p0['bias'], np.float32).reshape(-1)

    # layer 1: identity residual (in_dim == H*D) -> permuted identity
    w1p = np.asarray(p1['w'], np.float32)[qinv01, :]                  # (32, 32)
    eye = np.eye(HD[0], dtype=np.float32)[qinv01, :]                  # (32, 32)
    a1 = _attn_fold(p1['al'], p1['ar'], HEADS[1], NUM_HIDDEN[1])
    wf1 = np.concatenate([w1p, eye, w1p @ a1], axis=1)                # (32, 68)
    slab[W1_R0:W1_R0 + LAYER_IN[1], :wf1.shape[1]] = wf1
    slab[B1_R0, :HD[1]] = np.asarray(p1['bias'], np.float32).reshape(-1)

    # layer 2: linear residual
    w2p = np.asarray(p2['w'], np.float32)[qinv12, :]                  # (32, 8)
    wr2 = np.asarray(p2['w_res'], np.float32)[qinv12, :]              # (32, 8)
    a2 = _attn_fold(p2['al'], p2['ar'], HEADS[2], NUM_HIDDEN[2])
    wf2 = np.concatenate([w2p, wr2, w2p @ a2], axis=1)                # (32, 20)
    slab[W2_R0:W2_R0 + LAYER_IN[2], :wf2.shape[1]] = wf2
    slab[B2_R0, :HD[2]] = np.asarray(p2['bias'], np.float32).reshape(-1)

    # per-graph node-sum selector (2, 32) and conv bias scalar
    for b in range(BATCH_GRAPHS):
        slab[GSEL_R0 + b, b * N_PER_GRAPH:(b + 1) * N_PER_GRAPH] = 1.0
    slab[CB_R0, 0] = float(np.asarray(conv_b, np.float32).reshape(-1)[0])

    # ConvTranspose2d(C,1,K,S,P) as per-channel linear maps Mdec[c, node, pixel],
    # tiled over the batch of graphs, with the 1/H head-mean folded in.
    a_sel = np.zeros((GRID_WIDTH, KSIZE, IMAGE_WIDTH), np.float32)
    for i in range(GRID_WIDTH):
        for k in range(KSIZE):
            o = i * STRIDE - PAD + k
            if 0 <= o < IMAGE_WIDTH:
                a_sel[i, k, o] = 1.0
    cw = np.asarray(conv_w, np.float32)[:, 0]                         # (C, K, K)
    mdec = np.einsum('hko,wlp,ckl->chwop', a_sel, a_sel, cw)
    mdec = mdec.reshape(NUM_CHANNELS, N_PER_GRAPH, IMG_PIX)           # (C, 16, 144)
    mt = np.tile(mdec, (1, BATCH_GRAPHS, 1)) / float(HEADS[2])        # (C, 32, 144)
    slab[MT_R0:MT_R0 + NUM_CHANNELS * N_NODES, :] = mt.reshape(
        NUM_CHANNELS * N_NODES, IMG_PIX)

    # additive mask: 0 on edges, -1e9 off edges
    maskb = (np.asarray(adj, np.float32) - 1.0) * (-MASK_NEG)

    return jnp.asarray(maskb, jnp.float32), jnp.asarray(slab, jnp.float32)


# ------------------------- deterministic parameters -------------------------
def init_params(key):
    params = []
    in_dim = IN_DIM
    for l in range(GNN_LAYERS):
        out_dim, h_count = NUM_HIDDEN[l], HEADS[l]
        hd = h_count * out_dim
        key, k1, k2, k3, k4, k5 = jax.random.split(key, 6)
        w = jax.random.normal(k1, (in_dim, hd), jnp.float32) * 0.2
        al = jax.random.normal(k2, (h_count, out_dim), jnp.float32) * 0.2
        ar = jax.random.normal(k3, (h_count, out_dim), jnp.float32) * 0.2
        bias = jax.random.normal(k4, (1, hd), jnp.float32) * 0.01
        if l == 0 or in_dim == hd:
            w_res = None         # layer 0: residual=False; otherwise Identity res_fc
        else:
            w_res = jax.random.normal(k5, (in_dim, hd), jnp.float32) * 0.2
        params.append(dict(w=w, al=al, ar=ar, bias=bias, w_res=w_res))
        in_dim = out_dim * h_count
    key, kw, kb = jax.random.split(key, 3)
    conv_w = jax.random.normal(kw, (NUM_CHANNELS, 1, KSIZE, KSIZE),
                               jnp.float32) * 0.1            # (in, out, kh, kw)
    conv_b = jax.random.normal(kb, (1,), jnp.float32) * 0.01
    return params, conv_w, conv_b


def build_adjacency(batch, gw):
    # block-diagonal adjacency of `batch` grid graphs (4-neighbors + self loops)
    n_per = gw * gw
    a = np.zeros((batch * n_per, batch * n_per), np.float32)
    for b in range(batch):
        off = b * n_per
        for i in range(gw):
            for j in range(gw):
                u = off + i * gw + j
                a[u, u] = 1.0
                for di, dj in ((1, 0), (-1, 0), (0, 1), (0, -1)):
                    ni, nj = i + di, j + dj
                    if 0 <= ni < gw and 0 <= nj < gw:
                        a[u, off + ni * gw + nj] = 1.0
    return jnp.asarray(a)


# ------------------------- pure-JAX reference model -------------------------
def reference_forward(x, adj, raw_params, conv_w, conv_b):
    h = x
    n = x.shape[0]
    logits = None
    for l in range(GNN_LAYERS):
        p = raw_params[l]
        h_count, d_count = HEADS[l], NUM_HIDDEN[l]
        z = h @ p['w']
        z3 = z.reshape(n, h_count, d_count)
        el = jnp.sum(z3 * p['al'][None], axis=-1)            # (N, H) source
        er = jnp.sum(z3 * p['ar'][None], axis=-1)            # (N, H) dest
        e = er[:, None, :] + el[None, :, :]                  # e[v, u, h]
        e = jnp.where(e >= 0.0, e, NEG_SLOPE * e)
        e = jnp.where(adj[:, :, None] > 0, e, MASK_NEG)
        a = jax.nn.softmax(e, axis=1)
        rst = jnp.einsum('vuh,uhd->vhd', a, z3)
        if l > 0:
            if p['w_res'] is None:
                rst = rst + h.reshape(n, h_count, d_count)
            else:
                rst = rst + (h @ p['w_res']).reshape(n, h_count, d_count)
        rst = rst + p['bias'].reshape(1, h_count, d_count)
        if l < GNN_LAYERS - 1:
            out = _elu(rst)
            h = jnp.transpose(out, (0, 2, 1)).reshape(n, d_count * h_count)
        else:
            out = _sigmoid(rst)
            logits = jnp.mean(out, axis=1)                   # (N, C)

    x1 = logits.reshape(BATCH_GRAPHS, GRID_WIDTH, GRID_WIDTH, NUM_CHANNELS)
    x1 = jnp.transpose(x1, (0, 3, 1, 2))                     # (B, C, gw, gw)
    full_sz = (GRID_WIDTH - 1) * STRIDE + KSIZE
    full = jnp.zeros((BATCH_GRAPHS, full_sz, full_sz), jnp.float32)
    for ih in range(GRID_WIDTH):
        for iw in range(GRID_WIDTH):
            patch = jnp.einsum('bc,ckl->bkl', x1[:, :, ih, iw], conv_w[:, 0])
            full = full.at[:, ih * STRIDE:ih * STRIDE + KSIZE,
                           iw * STRIDE:iw * STRIDE + KSIZE].add(patch)
    img = full[:, PAD:PAD + IMAGE_WIDTH, PAD:PAD + IMAGE_WIDTH] + conv_b[0]
    return _sigmoid(img)


# ----------------------------------- main -----------------------------------
if __name__ == "__main__":
    key = jax.random.PRNGKey(0)
    key, kp, kx = jax.random.split(key, 3)
    raw_params, conv_w, conv_b = init_params(kp)
    x = jax.random.normal(kx, (N_NODES, IN_DIM), jnp.float32)
    adj = build_adjacency(BATCH_GRAPHS, GRID_WIDTH)

    maskb, slab = prepare_inputs(raw_params, conv_w, conv_b, adj)

    fwd = jax.jit(gat_mc_forward)
    out = jax.block_until_ready(fwd(x, maskb, slab))

    assert out.shape == (BATCH_GRAPHS, IMAGE_WIDTH, IMAGE_WIDTH), out.shape
    assert bool(jnp.all(jnp.isfinite(out)))
    assert bool(jnp.all((out >= 0.0) & (out <= 1.0)))        # final sigmoid range

    ref = reference_forward(x, adj, raw_params, conv_w, conv_b)
    max_err = float(jnp.max(jnp.abs(out - ref)))
    # tolerance covers the approximate (EUP) reciprocal in the softmax
    assert max_err < 1e-2, f"max abs err vs reference: {max_err}"

    print("KERNEL_OK")
</pallas_src>

<mosaic_0001>
module attributes {stable_mosaic.version = 11 : i64} {
  func.func @_fused_kernel(%arg0: i32, %arg1: memref<32x8xf32, #tpu.memory_space<vmem>>, %arg2: memref<32x32xf32, #tpu.memory_space<vmem>>, %arg3: memref<240x144xf32, #tpu.memory_space<vmem>>, %arg4: memref<2x144xf32, #tpu.memory_space<vmem>>) attributes {dimension_semantics = [#tpu.dimension_semantics<arbitrary>], iteration_bounds = array<i64: 1>, scalar_prefetch = 0 : i64, scratch_operands = 0 : i64, tpu.core_type = #tpu.core_type<tc>, window_params = [{pipeline_mode = #tpu.pipeline_mode<synchronous>, transform_indices = @transform_0, window_bounds = array<i64: 32, 8>}, {pipeline_mode = #tpu.pipeline_mode<synchronous>, transform_indices = @transform_1, window_bounds = array<i64: 32, 32>}, {pipeline_mode = #tpu.pipeline_mode<synchronous>, transform_indices = @transform_2, window_bounds = array<i64: 240, 144>}, {pipeline_mode = #tpu.pipeline_mode<synchronous>, transform_indices = @transform_3, window_bounds = array<i64: 2, 144>}]} {
    %c0 = arith.constant 0 : index
    %c0_0 = arith.constant 0 : index
    %0 = vector.load %arg2[%c0, %c0_0] : memref<32x32xf32, #tpu.memory_space<vmem>>, vector<32x32xf32>
    %c0_1 = arith.constant 0 : index
    %c0_2 = arith.constant 0 : index
    %1 = vector.load %arg1[%c0_1, %c0_2] : memref<32x8xf32, #tpu.memory_space<vmem>>, vector<32x8xf32>
    %c0_3 = arith.constant 0 : index
    %c0_4 = arith.constant 0 : index
    %2 = vector.load %arg3[%c0_3, %c0_4] : memref<240x144xf32, #tpu.memory_space<vmem>>, vector<8x36xf32>
    %cst = arith.constant dense<0.000000e+00> : vector<32x36xf32>
    %3 = tpu.matmul %1, %2, %cst {dimension_numbers = #tpu.dot_dimension_numbers<[1], [0], [0], [1], [0, 0, 1, 1], [], []>} : vector<32x8xf32>, vector<8x36xf32>, vector<32x36xf32> -> vector<32x36xf32>
    %4 = vector.extract_strided_slice %3 {offsets = [0, 0], sizes = [32, 32], strides = [1, 1]} : vector<32x36xf32> to vector<32x32xf32>
    %5 = vector.extract_strided_slice %3 {offsets = [0, 32], sizes = [32, 1], strides = [1, 1]} : vector<32x36xf32> to vector<32x1xf32>
    %6 = vector.extract_strided_slice %3 {offsets = [0, 34], sizes = [32, 1], strides = [1, 1]} : vector<32x36xf32> to vector<32x1xf32>
    %7 = tpu.transpose %5, [1, 0] : vector<32x1xf32> -> vector<1x32xf32>
    %8 = vector.broadcast %6 : vector<32x1xf32> to vector<32x32xf32>
    %9 = vector.broadcast %7 : vector<1x32xf32> to vector<32x32xf32>
    %10 = arith.addf %8, %9 : vector<32x32xf32>
    %cst_5 = arith.constant 0.000000e+00 : f32
    %11 = vector.broadcast %cst_5 : f32 to vector<32x32xf32>
    %12 = arith.cmpf oge, %10, %11 : vector<32x32xf32>
    %cst_6 = arith.constant 2.000000e-01 : f32
    %13 = vector.broadcast %cst_6 : f32 to vector<32x32xf32>
    %14 = arith.mulf %13, %10 : vector<32x32xf32>
    %15 = arith.select %12, %10, %14 : vector<32x32xi1>, vector<32x32xf32>
    %16 = arith.addf %15, %0 : vector<32x32xf32>
    %cst_7 = arith.constant dense<0xFF800000> : vector<32xf32>
    %17 = vector.multi_reduction <maximumf>, %16, %cst_7 [1] : vector<32x32xf32> to vector<32xf32>
    %18 = vector.shape_cast %17 : vector<32xf32> to vector<32x1xf32>
    %19 = vector.broadcast %18 : vector<32x1xf32> to vector<32x32xf32>
    %20 = arith.subf %16, %19 : vector<32x32xf32>
    %21 = math.exp %20 : vector<32x32xf32>
    %cst_8 = arith.constant dense<0.000000e+00> : vector<32xf32>
    %22 = vector.multi_reduction <add>, %21, %cst_8 [1] : vector<32x32xf32> to vector<32xf32>
    %23 = vector.shape_cast %22 : vector<32xf32> to vector<32x1xf32>
    %cst_9 = arith.constant dense<0.000000e+00> : vector<32x32xf32>
    %24 = tpu.matmul %21, %4, %cst_9 {dimension_numbers = #tpu.dot_dimension_numbers<[1], [0], [0], [1], [0, 0, 1, 1], [], []>} : vector<32x32xf32>, vector<32x32xf32>, vector<32x32xf32> -> vector<32x32xf32>
    %25 = vector.extract_strided_slice %3 {offsets = [0, 33], sizes = [32, 1], strides = [1, 1]} : vector<32x36xf32> to vector<32x1xf32>
    %26 = vector.extract_strided_slice %3 {offsets = [0, 35], sizes = [32, 1], strides = [1, 1]} : vector<32x36xf32> to vector<32x1xf32>
    %27 = tpu.transpose %25, [1, 0] : vector<32x1xf32> -> vector<1x32xf32>
    %28 = vector.broadcast %26 : vector<32x1xf32> to vector<32x32xf32>
    %29 = vector.broadcast %27 : vector<1x32xf32> to vector<32x32xf32>
    %30 = arith.addf %28, %29 : vector<32x32xf32>
    %cst_10 = arith.constant 0.000000e+00 : f32
    %31 = vector.broadcast %cst_10 : f32 to vector<32x32xf32>
    %32 = arith.cmpf oge, %30, %31 : vector<32x32xf32>
    %cst_11 = arith.constant 2.000000e-01 : f32
    %33 = vector.broadcast %cst_11 : f32 to vector<32x32xf32>
    %34 = arith.mulf %33, %30 : vector<32x32xf32>
    %35 = arith.select %32, %30, %34 : vector<32x32xi1>, vector<32x32xf32>
    %36 = arith.addf %35, %0 : vector<32x32xf32>
    %cst_12 = arith.constant dense<0xFF800000> : vector<32xf32>
    %37 = vector.multi_reduction <maximumf>, %36, %cst_12 [1] : vector<32x32xf32> to vector<32xf32>
    %38 = vector.shape_cast %37 : vector<32xf32> to vector<32x1xf32>
    %39 = vector.broadcast %38 : vector<32x1xf32> to vector<32x32xf32>
    %40 = arith.subf %36, %39 : vector<32x32xf32>
    %41 = math.exp %40 : vector<32x32xf32>
    %cst_13 = arith.constant dense<0.000000e+00> : vector<32xf32>
    %42 = vector.multi_reduction <add>, %41, %cst_13 [1] : vector<32x32xf32> to vector<32xf32>
    %43 = vector.shape_cast %42 : vector<32xf32> to vector<32x1xf32>
    %cst_14 = arith.constant dense<0.000000e+00> : vector<32x32xf32>
    %44 = tpu.matmul %41, %4, %cst_14 {dimension_numbers = #tpu.dot_dimension_numbers<[1], [0], [0], [1], [0, 0, 1, 1], [], []>} : vector<32x32xf32>, vector<32x32xf32>, vector<32x32xf32> -> vector<32x32xf32>
    %45 = tpu.iota {dimensions = array<i32: 1>} : vector<32x32xi32>
    %c16_i32 = arith.constant 16 : i32
    %46 = vector.broadcast %c16_i32 : i32 to vector<32x32xi32>
    %47 = arith.cmpi slt, %45, %46 : vector<32x32xi32>
    %48 = arith.select %47, %24, %44 : vector<32x32xi1>, vector<32x32xf32>
    %49 = vector.shape_cast %23 : vector<32x1xf32> to vector<32x1xf32>
    %50 = vector.broadcast %49 : vector<32x1xf32> to vector<32x32xf32>
    %51 = vector.shape_cast %43 : vector<32x1xf32> to vector<32x1xf32>
    %52 = vector.broadcast %51 : vector<32x1xf32> to vector<32x32xf32>
    %53 = arith.select %47, %50, %52 : vector<32x32xi1>, vector<32x32xf32>
    %54 = tpu.reciprocal %53 {approx = true} : vector<32x32xf32> -> vector<32x32xf32>
    %55 = arith.mulf %48, %54 : vector<32x32xf32>
    %c8 = arith.constant 8 : index
    %c0_15 = arith.constant 0 : index
    %56 = vector.load %arg3[%c8, %c0_15] : memref<240x144xf32, #tpu.memory_space<vmem>>, vector<1x32xf32>
    %57 = vector.broadcast %56 : vector<1x32xf32> to vector<32x32xf32>
    %58 = arith.addf %55, %57 : vector<32x32xf32>
    %cst_16 = arith.constant 0.000000e+00 : f32
    %59 = vector.broadcast %cst_16 : f32 to vector<32x32xf32>
    %60 = arith.cmpf ogt, %58, %59 : vector<32x32xf32>
    %cst_17 = arith.constant 0.000000e+00 : f32
    %61 = vector.broadcast %cst_17 : f32 to vector<32x32xf32>
    %62 = arith.minimumf %58, %61 : vector<32x32xf32>
    %63 = math.exp %62 : vector<32x32xf32>
    %cst_18 = arith.constant 1.000000e+00 : f32
    %64 = vector.broadcast %cst_18 : f32 to vector<32x32xf32>
    %65 = arith.subf %63, %64 : vector<32x32xf32>
    %66 = arith.select %60, %58, %65 : vector<32x32xi1>, vector<32x32xf32>
    %c16 = arith.constant 16 : index
    %c0_19 = arith.constant 0 : index
    %67 = vector.load %arg3[%c16, %c0_19] : memref<240x144xf32, #tpu.memory_space<vmem>>, vector<32x68xf32>
    %cst_20 = arith.constant dense<0.000000e+00> : vector<32x68xf32>
    %68 = tpu.matmul %66, %67, %cst_20 {dimension_numbers = #tpu.dot_dimension_numbers<[1], [0], [0], [1], [0, 0, 1, 1], [], []>} : vector<32x32xf32>, vector<32x68xf32>, vector<32x68xf32> -> vector<32x68xf32>
    %69 = vector.extract_strided_slice %68 {offsets = [0, 0], sizes = [32, 32], strides = [1, 1]} : vector<32x68xf32> to vector<32x32xf32>
    %70 = vector.extract_strided_slice %68 {offsets = [0, 64], sizes = [32, 1], strides = [1, 1]} : vector<32x68xf32> to vector<32x1xf32>
    %71 = vector.extract_strided_slice %68 {offsets = [0, 66], sizes = [32, 1], strides = [1, 1]} : vector<32x68xf32> to vector<32x1xf32>
    %72 = tpu.transpose %70, [1, 0] : vector<32x1xf32> -> vector<1x32xf32>
    %73 = vector.broadcast %71 : vector<32x1xf32> to vector<32x32xf32>
    %74 = vector.broadcast %72 : vector<1x32xf32> to vector<32x32xf32>
    %75 = arith.addf %73, %74 : vector<32x32xf32>
    %cst_21 = arith.constant 0.000000e+00 : f32
    %76 = vector.broadcast %cst_21 : f32 to vector<32x32xf32>
    %77 = arith.cmpf oge, %75, %76 : vector<32x32xf32>
    %cst_22 = arith.constant 2.000000e-01 : f32
    %78 = vector.broadcast %cst_22 : f32 to vector<32x32xf32>
    %79 = arith.mulf %78, %75 : vector<32x32xf32>
    %80 = arith.select %77, %75, %79 : vector<32x32xi1>, vector<32x32xf32>
    %81 = arith.addf %80, %0 : vector<32x32xf32>
    %cst_23 = arith.constant dense<0xFF800000> : vector<32xf32>
    %82 = vector.multi_reduction <maximumf>, %81, %cst_23 [1] : vector<32x32xf32> to vector<32xf32>
    %83 = vector.shape_cast %82 : vector<32xf32> to vector<32x1xf32>
    %84 = vector.broadcast %83 : vector<32x1xf32> to vector<32x32xf32>
    %85 = arith.subf %81, %84 : vector<32x32xf32>
    %86 = math.exp %85 : vector<32x32xf32>
    %cst_24 = arith.constant dense<0.000000e+00> : vector<32xf32>
    %87 = vector.multi_reduction <add>, %86, %cst_24 [1] : vector<32x32xf32> to vector<32xf32>
    %88 = vector.shape_cast %87 : vector<32xf32> to vector<32x1xf32>
    %cst_25 = arith.constant dense<0.000000e+00> : vector<32x32xf32>
    %89 = tpu.matmul %86, %69, %cst_25 {dimension_numbers = #tpu.dot_dimension_numbers<[1], [0], [0], [1], [0, 0, 1, 1], [], []>} : vector<32x32xf32>, vector<32x32xf32>, vector<32x32xf32> -> vector<32x32xf32>
    %90 = vector.extract_strided_slice %68 {offsets = [0, 65], sizes = [32, 1], strides = [1, 1]} : vector<32x68xf32> to vector<32x1xf32>
    %91 = vector.extract_strided_slice %68 {offsets = [0, 67], sizes = [32, 1], strides = [1, 1]} : vector<32x68xf32> to vector<32x1xf32>
    %92 = tpu.transpose %90, [1, 0] : vector<32x1xf32> -> vector<1x32xf32>
    %93 = vector.broadcast %91 : vector<32x1xf32> to vector<32x32xf32>
    %94 = vector.broadcast %92 : vector<1x32xf32> to vector<32x32xf32>
    %95 = arith.addf %93, %94 : vector<32x32xf32>
    %cst_26 = arith.constant 0.000000e+00 : f32
    %96 = vector.broadcast %cst_26 : f32 to vector<32x32xf32>
    %97 = arith.cmpf oge, %95, %96 : vector<32x32xf32>
    %cst_27 = arith.constant 2.000000e-01 : f32
    %98 = vector.broadcast %cst_27 : f32 to vector<32x32xf32>
    %99 = arith.mulf %98, %95 : vector<32x32xf32>
    %100 = arith.select %97, %95, %99 : vector<32x32xi1>, vector<32x32xf32>
    %101 = arith.addf %100, %0 : vector<32x32xf32>
    %cst_28 = arith.constant dense<0xFF800000> : vector<32xf32>
    %102 = vector.multi_reduction <maximumf>, %101, %cst_28 [1] : vector<32x32xf32> to vector<32xf32>
    %103 = vector.shape_cast %102 : vector<32xf32> to vector<32x1xf32>
    %104 = vector.broadcast %103 : vector<32x1xf32> to vector<32x32xf32>
    %105 = arith.subf %101, %104 : vector<32x32xf32>
    %106 = math.exp %105 : vector<32x32xf32>
    %cst_29 = arith.constant dense<0.000000e+00> : vector<32xf32>
    %107 = vector.multi_reduction <add>, %106, %cst_29 [1] : vector<32x32xf32> to vector<32xf32>
    %108 = vector.shape_cast %107 : vector<32xf32> to vector<32x1xf32>
    %cst_30 = arith.constant dense<0.000000e+00> : vector<32x32xf32>
    %109 = tpu.matmul %106, %69, %cst_30 {dimension_numbers = #tpu.dot_dimension_numbers<[1], [0], [0], [1], [0, 0, 1, 1], [], []>} : vector<32x32xf32>, vector<32x32xf32>, vector<32x32xf32> -> vector<32x32xf32>
    %110 = tpu.iota {dimensions = array<i32: 1>} : vector<32x32xi32>
    %c16_i32_31 = arith.constant 16 : i32
    %111 = vector.broadcast %c16_i32_31 : i32 to vector<32x32xi32>
    %112 = arith.cmpi slt, %110, %111 : vector<32x32xi32>
    %113 = arith.select %112, %89, %109 : vector<32x32xi1>, vector<32x32xf32>
    %114 = vector.shape_cast %88 : vector<32x1xf32> to vector<32x1xf32>
    %115 = vector.broadcast %114 : vector<32x1xf32> to vector<32x32xf32>
    %116 = vector.shape_cast %108 : vector<32x1xf32> to vector<32x1xf32>
    %117 = vector.broadcast %116 : vector<32x1xf32> to vector<32x32xf32>
    %118 = arith.select %112, %115, %117 : vector<32x32xi1>, vector<32x32xf32>
    %119 = tpu.reciprocal %118 {approx = true} : vector<32x32xf32> -> vector<32x32xf32>
    %120 = arith.mulf %113, %119 : vector<32x32xf32>
    %121 = vector.extract_strided_slice %68 {offsets = [0, 32], sizes = [32, 32], strides = [1, 1]} : vector<32x68xf32> to vector<32x32xf32>
    %122 = arith.addf %120, %121 : vector<32x32xf32>
    %c48 = arith.constant 48 : index
    %c0_32 = arith.constant 0 : index
    %123 = vector.load %arg3[%c48, %c0_32] : memref<240x144xf32, #tpu.memory_space<vmem>>, vector<1x32xf32>
    %124 = vector.broadcast %123 : vector<1x32xf32> to vector<32x32xf32>
    %125 = arith.addf %122, %124 : vector<32x32xf32>
    %cst_33 = arith.constant 0.000000e+00 : f32
    %126 = vector.broadcast %cst_33 : f32 to vector<32x32xf32>
    %127 = arith.cmpf ogt, %125, %126 : vector<32x32xf32>
    %cst_34 = arith.constant 0.000000e+00 : f32
    %128 = vector.broadcast %cst_34 : f32 to vector<32x32xf32>
    %129 = arith.minimumf %125, %128 : vector<32x32xf32>
    %130 = math.exp %129 : vector<32x32xf32>
    %cst_35 = arith.constant 1.000000e+00 : f32
    %131 = vector.broadcast %cst_35 : f32 to vector<32x32xf32>
    %132 = arith.subf %130, %131 : vector<32x32xf32>
    %133 = arith.select %127, %125, %132 : vector<32x32xi1>, vector<32x32xf32>
    %c56 = arith.constant 56 : index
    %c0_36 = arith.constant 0 : index
    %134 = vector.load %arg3[%c56, %c0_36] : memref<240x144xf32, #tpu.memory_space<vmem>>, vector<32x20xf32>
    %cst_37 = arith.constant dense<0.000000e+00> : vector<32x20xf32>
    %135 = tpu.matmul %133, %134, %cst_37 {dimension_numbers = #tpu.dot_dimension_numbers<[1], [0], [0], [1], [0, 0, 1, 1], [], []>} : vector<32x32xf32>, vector<32x20xf32>, vector<32x20xf32> -> vector<32x20xf32>
    %136 = vector.extract_strided_slice %135 {offsets = [0, 0], sizes = [32, 8], strides = [1, 1]} : vector<32x20xf32> to vector<32x8xf32>
    %137 = vector.extract_strided_slice %135 {offsets = [0, 16], sizes = [32, 1], strides = [1, 1]} : vector<32x20xf32> to vector<32x1xf32>
    %138 = vector.extract_strided_slice %135 {offsets = [0, 18], sizes = [32, 1], strides = [1, 1]} : vector<32x20xf32> to vector<32x1xf32>
    %139 = tpu.transpose %137, [1, 0] : vector<32x1xf32> -> vector<1x32xf32>
    %140 = vector.broadcast %138 : vector<32x1xf32> to vector<32x32xf32>
    %141 = vector.broadcast %139 : vector<1x32xf32> to vector<32x32xf32>
    %142 = arith.addf %140, %141 : vector<32x32xf32>
    %cst_38 = arith.constant 0.000000e+00 : f32
    %143 = vector.broadcast %cst_38 : f32 to vector<32x32xf32>
    %144 = arith.cmpf oge, %142, %143 : vector<32x32xf32>
    %cst_39 = arith.constant 2.000000e-01 : f32
    %145 = vector.broadcast %cst_39 : f32 to vector<32x32xf32>
    %146 = arith.mulf %145, %142 : vector<32x32xf32>
    %147 = arith.select %144, %142, %146 : vector<32x32xi1>, vector<32x32xf32>
    %148 = arith.addf %147, %0 : vector<32x32xf32>
    %cst_40 = arith.constant dense<0xFF800000> : vector<32xf32>
    %149 = vector.multi_reduction <maximumf>, %148, %cst_40 [1] : vector<32x32xf32> to vector<32xf32>
    %150 = vector.shape_cast %149 : vector<32xf32> to vector<32x1xf32>
    %151 = vector.broadcast %150 : vector<32x1xf32> to vector<32x32xf32>
    %152 = arith.subf %148, %151 : vector<32x32xf32>
    %153 = math.exp %152 : vector<32x32xf32>
    %cst_41 = arith.constant dense<0.000000e+00> : vector<32xf32>
    %154 = vector.multi_reduction <add>, %153, %cst_41 [1] : vector<32x32xf32> to vector<32xf32>
    %155 = vector.shape_cast %154 : vector<32xf32> to vector<32x1xf32>
    %cst_42 = arith.constant dense<0.000000e+00> : vector<32x8xf32>
    %156 = tpu.matmul %153, %136, %cst_42 {dimension_numbers = #tpu.dot_dimension_numbers<[1], [0], [0], [1], [0, 0, 1, 1], [], []>} : vector<32x32xf32>, vector<32x8xf32>, vector<32x8xf32> -> vector<32x8xf32>
    %157 = vector.extract_strided_slice %135 {offsets = [0, 17], sizes = [32, 1], strides = [1, 1]} : vector<32x20xf32> to vector<32x1xf32>
    %158 = vector.extract_strided_slice %135 {offsets = [0, 19], sizes = [32, 1], strides = [1, 1]} : vector<32x20xf32> to vector<32x1xf32>
    %159 = tpu.transpose %157, [1, 0] : vector<32x1xf32> -> vector<1x32xf32>
    %160 = vector.broadcast %158 : vector<32x1xf32> to vector<32x32xf32>
    %161 = vector.broadcast %159 : vector<1x32xf32> to vector<32x32xf32>
    %162 = arith.addf %160, %161 : vector<32x32xf32>
    %cst_43 = arith.constant 0.000000e+00 : f32
    %163 = vector.broadcast %cst_43 : f32 to vector<32x32xf32>
    %164 = arith.cmpf oge, %162, %163 : vector<32x32xf32>
    %cst_44 = arith.constant 2.000000e-01 : f32
    %165 = vector.broadcast %cst_44 : f32 to vector<32x32xf32>
    %166 = arith.mulf %165, %162 : vector<32x32xf32>
    %167 = arith.select %164, %162, %166 : vector<32x32xi1>, vector<32x32xf32>
    %168 = arith.addf %167, %0 : vector<32x32xf32>
    %cst_45 = arith.constant dense<0xFF800000> : vector<32xf32>
    %169 = vector.multi_reduction <maximumf>, %168, %cst_45 [1] : vector<32x32xf32> to vector<32xf32>
    %170 = vector.shape_cast %169 : vector<32xf32> to vector<32x1xf32>
    %171 = vector.broadcast %170 : vector<32x1xf32> to vector<32x32xf32>
    %172 = arith.subf %168, %171 : vector<32x32xf32>
    %173 = math.exp %172 : vector<32x32xf32>
    %cst_46 = arith.constant dense<0.000000e+00> : vector<32xf32>
    %174 = vector.multi_reduction <add>, %173, %cst_46 [1] : vector<32x32xf32> to vector<32xf32>
    %175 = vector.shape_cast %174 : vector<32xf32> to vector<32x1xf32>
    %cst_47 = arith.constant dense<0.000000e+00> : vector<32x8xf32>
    %176 = tpu.matmul %173, %136, %cst_47 {dimension_numbers = #tpu.dot_dimension_numbers<[1], [0], [0], [1], [0, 0, 1, 1], [], []>} : vector<32x32xf32>, vector<32x8xf32>, vector<32x8xf32> -> vector<32x8xf32>
    %177 = tpu.iota {dimensions = array<i32: 1>} : vector<32x8xi32>
    %c4_i32 = arith.constant 4 : i32
    %178 = vector.broadcast %c4_i32 : i32 to vector<32x8xi32>
    %179 = arith.cmpi slt, %177, %178 : vector<32x8xi32>
    %180 = arith.select %179, %156, %176 : vector<32x8xi1>, vector<32x8xf32>
    %181 = vector.shape_cast %155 : vector<32x1xf32> to vector<32x1xf32>
    %182 = vector.broadcast %181 : vector<32x1xf32> to vector<32x8xf32>
    %183 = vector.shape_cast %175 : vector<32x1xf32> to vector<32x1xf32>
    %184 = vector.broadcast %183 : vector<32x1xf32> to vector<32x8xf32>
    %185 = arith.select %179, %182, %184 : vector<32x8xi1>, vector<32x8xf32>
    %186 = tpu.reciprocal %185 {approx = true} : vector<32x8xf32> -> vector<32x8xf32>
    %187 = arith.mulf %180, %186 : vector<32x8xf32>
    %188 = vector.extract_strided_slice %135 {offsets = [0, 8], sizes = [32, 8], strides = [1, 1]} : vector<32x20xf32> to vector<32x8xf32>
    %189 = arith.addf %187, %188 : vector<32x8xf32>
    %c88 = arith.constant 88 : index
    %c0_48 = arith.constant 0 : index
    %190 = vector.load %arg3[%c88, %c0_48] : memref<240x144xf32, #tpu.memory_space<vmem>>, vector<1x8xf32>
    %191 = vector.broadcast %190 : vector<1x8xf32> to vector<32x8xf32>
    %192 = arith.addf %189, %191 : vector<32x8xf32>
    %cst_49 = arith.constant 0.000000e+00 : f32
    %193 = vector.broadcast %cst_49 : f32 to vector<32x8xf32>
    %194 = arith.subf %193, %192 : vector<32x8xf32>
    %195 = math.exp %194 : vector<32x8xf32>
    %cst_50 = arith.constant 1.000000e+00 : f32
    %196 = vector.broadcast %cst_50 : f32 to vector<32x8xf32>
    %197 = arith.addf %196, %195 : vector<32x8xf32>
    %cst_51 = arith.constant 1.000000e+00 : f32
    %198 = vector.broadcast %cst_51 : f32 to vector<32x8xf32>
    %199 = arith.divf %198, %197 : vector<32x8xf32>
    %200 = vector.extract_strided_slice %199 {offsets = [0, 0], sizes = [32, 4], strides = [1, 1]} : vector<32x8xf32> to vector<32x4xf32>
    %201 = vector.extract_strided_slice %199 {offsets = [0, 4], sizes = [32, 4], strides = [1, 1]} : vector<32x8xf32> to vector<32x4xf32>
    %202 = arith.addf %200, %201 : vector<32x4xf32>
    %203 = vector.extract_strided_slice %202 {offsets = [0, 0], sizes = [32, 1], strides = [1, 1]} : vector<32x4xf32> to vector<32x1xf32>
    %c112 = arith.constant 112 : index
    %c0_52 = arith.constant 0 : index
    %204 = vector.load %arg3[%c112, %c0_52] : memref<240x144xf32, #tpu.memory_space<vmem>>, vector<32x144xf32>
    %205 = vector.broadcast %203 : vector<32x1xf32> to vector<32x144xf32>
    %206 = arith.mulf %205, %204 : vector<32x144xf32>
    %c144 = arith.constant 144 : index
    %c0_53 = arith.constant 0 : index
    %207 = vector.load %arg3[%c144, %c0_53] : memref<240x144xf32, #tpu.memory_space<vmem>>, vector<32x144xf32>
    %208 = vector.extract_strided_slice %202 {offsets = [0, 1], sizes = [32, 1], strides = [1, 1]} : vector<32x4xf32> to vector<32x1xf32>
    %209 = vector.broadcast %208 : vector<32x1xf32> to vector<32x144xf32>
    %210 = arith.mulf %209, %207 : vector<32x144xf32>
    %211 = arith.addf %206, %210 : vector<32x144xf32>
    %c176 = arith.constant 176 : index
    %c0_54 = arith.constant 0 : index
    %212 = vector.load %arg3[%c176, %c0_54] : memref<240x144xf32, #tpu.memory_space<vmem>>, vector<32x144xf32>
    %213 = vector.extract_strided_slice %202 {offsets = [0, 2], sizes = [32, 1], strides = [1, 1]} : vector<32x4xf32> to vector<32x1xf32>
    %214 = vector.broadcast %213 : vector<32x1xf32> to vector<32x144xf32>
    %215 = arith.mulf %214, %212 : vector<32x144xf32>
    %216 = arith.addf %211, %215 : vector<32x144xf32>
    %c208 = arith.constant 208 : index
    %c0_55 = arith.constant 0 : index
    %217 = vector.load %arg3[%c208, %c0_55] : memref<240x144xf32, #tpu.memory_space<vmem>>, vector<32x144xf32>
    %218 = vector.extract_strided_slice %202 {offsets = [0, 3], sizes = [32, 1], strides = [1, 1]} : vector<32x4xf32> to vector<32x1xf32>
    %219 = vector.broadcast %218 : vector<32x1xf32> to vector<32x144xf32>
    %220 = arith.mulf %219, %217 : vector<32x144xf32>
    %221 = arith.addf %216, %220 : vector<32x144xf32>
    %c96 = arith.constant 96 : index
    %c0_56 = arith.constant 0 : index
    %222 = vector.load %arg3[%c96, %c0_56] : memref<240x144xf32, #tpu.memory_space<vmem>>, vector<2x32xf32>
    %c104 = arith.constant 104 : index
    %c0_57 = arith.constant 0 : index
    %223 = vector.load %arg3[%c104, %c0_57] : memref<240x144xf32, #tpu.memory_space<vmem>>, vector<1x1xf32>
    %cst_58 = arith.constant dense<0.000000e+00> : vector<2x144xf32>
    %224 = tpu.matmul %222, %221, %cst_58 {dimension_numbers = #tpu.dot_dimension_numbers<[1], [0], [0], [1], [0, 0, 1, 1], [], []>} : vector<2x32xf32>, vector<32x144xf32>, vector<2x144xf32> -> vector<2x144xf32>
    %225 = vector.broadcast %223 : vector<1x1xf32> to vector<2x144xf32>
    %226 = arith.addf %224, %225 : vector<2x144xf32>
    %cst_59 = arith.constant 0.000000e+00 : f32
    %227 = vector.broadcast %cst_59 : f32 to vector<2x144xf32>
    %228 = arith.subf %227, %226 : vector<2x144xf32>
    %229 = math.exp %228 : vector<2x144xf32>
    %cst_60 = arith.constant 1.000000e+00 : f32
    %230 = vector.broadcast %cst_60 : f32 to vector<2x144xf32>
    %231 = arith.addf %230, %229 : vector<2x144xf32>
    %cst_61 = arith.constant 1.000000e+00 : f32
    %232 = vector.broadcast %cst_61 : f32 to vector<2x144xf32>
    %233 = arith.divf %232, %231 : vector<2x144xf32>
    %c0_62 = arith.constant 0 : index
    %c0_63 = arith.constant 0 : index
    %234 = vector.load %arg4[%c0_62, %c0_63] : memref<2x144xf32, #tpu.memory_space<vmem>>, vector<2x144xf32>
    tpu.vector_store %arg4[%c0_62, %c0_63], %233 {strides = array<i32>} : memref<2x144xf32, #tpu.memory_space<vmem>>, vector<2x144xf32>,
    return
  }
  func.func @transform_0(%arg0: i32) -> (i32, i32) {
    %c0_i32 = arith.constant 0 : i32
    %c0_i32_0 = arith.constant 0 : i32
    %c0_i32_1 = arith.constant 0 : i32
    return %c0_i32, %c0_i32_0 : i32, i32
  }
  func.func @transform_1(%arg0: i32) -> (i32, i32) {
    %c0_i32 = arith.constant 0 : i32
    %c0_i32_0 = arith.constant 0 : i32
    %c0_i32_1 = arith.constant 0 : i32
    return %c0_i32, %c0_i32_0 : i32, i32
  }
  func.func @transform_2(%arg0: i32) -> (i32, i32) {
    %c0_i32 = arith.constant 0 : i32
    %c0_i32_0 = arith.constant 0 : i32
    %c0_i32_1 = arith.constant 0 : i32
    return %c0_i32, %c0_i32_0 : i32, i32
  }
  func.func @transform_3(%arg0: i32) -> (i32, i32) {
    %c0_i32 = arith.constant 0 : i32
    %c0_i32_0 = arith.constant 0 : i32
    %c0_i32_1 = arith.constant 0 : i32
    return %c0_i32, %c0_i32_0 : i32, i32
  }
}

</mosaic_0001>

<bundles_post_ra>
// kernel: gat_mc_forward.1
= control target key start
LH: loop header
LB: loop body
LE: loop exit
PB: predicated region body
PF: predicated region fallthrough
CT: control target
= control target key end

     0   :  { %vm23_vm0 = vcmask 64512   ;;  %v1832_v3 = vmov 35   ;;  %v1833_v6 = vmov 34   ;;  %s1834_s22 = smov 96   ;;  %s1835_s23 = smov 95   ;;  %vm150_vm3 = vcmask 261120   ;;  %s2324_s2 = inlined_call_operand.vmem [shape: f32[240,144], index: 2, kind: input, shape index: {}]   ;;  %s2325_s0 = inlined_call_operand.vmem [shape: f32[32,8], index: 0, kind: input, shape index: {}]   ;;  %s2326_s1 = inlined_call_operand.vmem [shape: f32[32,32], index: 1, kind: input, shape index: {}]   ;;  %s2327_s3 = inlined_call_operand.vmem [shape: f32[2,144], index: 3, kind: output, shape index: {}]  }
   0x1   :  { %v22_v0 = vld [vmem:[%s2324_s2] sm:$0xff]  ;;  %v20_v2 = vld [vmem:[%s2325_s0 + $0x10] sm:$0xff]  ;;  %1682 = vset.pattern.permute.xlu2 %v1832_v3  ;;  %1684 = vset.pattern.permute.xlu1 %v1832_v3  ;;  %v19_v4 = vld [vmem:[%s2325_s0 + $0x8] sm:$0xff]  ;;  %s1838_s14 = smov 63   ;;  %s1839_s15 = smov 64  }
   0x2   :  { %v18_v1 = vld [vmem:[%s2325_s0] sm:$0xff]  ;;  %51 = vmatpush.msra.mxu0 %v22_v0  ;;  %1662 = vmatpush.msra.mxu3 %v22_v0  ;;  %v21_v5 = vld [vmem:[%s2325_s0 + $0x18] sm:$0xff]  ;;  %v1892_v28 = vld [vmem:[%s2326_s1 + $0x8] sm:$0xff]  ;;  %s1842_s25 = smov 111   ;;  %s1843_s26 = smov 112  }
   0x3   :  { %1616 = vmatmul.msk.f32.vlgmr.msra.gmra.mxu0 %vm23_vm0, %v18_v1  ;;  %1618 = vmatmul.msk.f32.vlgmr.msra.gmra.mxu3 %vm23_vm0, %v20_v2  ;;  %v1897_v29 = vld [vmem:[%s2326_s1] sm:$0xff]  ;;  %v1910_v55 = vld [vmem:[%s2326_s1 + $0x10] sm:$0xff]  ;;  %s1844_s6 = smov 120   ;;  %s1845_s10 = smov 124  }
   0x4   :  { %1683 = vset.pattern.permute.xlu0 %v1833_v6 }
   0xb   :  { %1617 = vmatmul.msk.f32.gmra.mxu0 %vm23_vm0, %v19_v4  ;;  %1619 = vmatmul.msk.f32.gmra.mxu3 %vm23_vm0, %v21_v5  ;;  %v1919_v4 = vld [vmem:[%s2326_s1 + $0x18] sm:$0xff] }
  0x80   :  { %v53_v7 = vpop.f32.mrf.mxu0 }
  0x81   :  { %273 = vperm.xlu2 %1682, %v53_v7   ;;  %69 = vrot.lane.b32.xlu1 %v53_v7, %s1834_s22 }
  0x82   :  { %228 = vrot.lane.b32.xlu0 %v53_v7, %s1835_s23 }
  0x86   :  { %v59_v8 = vpop.f32.mrf.mxu3 }
  0x88   :  { %v56_v9 = vpop.f32.mrf.mxu0 }
  0x89   :  { %232 = vrot.lane.b32.xlu1 %v59_v8, %s1835_s23  ;;  %71 = vrot.lane.b32.xlu2 %v56_v9, %s1834_s22 }
  0x8a   :  { %114 = vperm.xlu0 %1683, %v53_v7   ;;  %1685 = vset.pattern.permute.xlu2 %v1833_v6 }
  0x8e   :  { %v62_v10 = vpop.f32.mrf.mxu3 }
  0x8f   :  { %211 = vmatpush.msra.mxu1 %v62_v10  ;;  %369 = vmatpush.msra.mxu2 %v62_v10 }
  0x91   :  { %212 = vmatpush.msra.mxu1 %v59_v8  ;;  %370 = vmatpush.msra.mxu2 %v59_v8 }
  0x92   :  { %73 = vrot.lane.b32.xlu0 %v59_v8, %s1834_s22  ;;  %277 = vperm.xlu1 %1684, %v56_v9  }
  0x93   :  { %118 = vperm.xlu2 %1685, %v56_v9   ;;  %213 = vmatpush.msra.mxu1 %v56_v9 }
  0x94   :  { %371 = vmatpush.msra.mxu2 %v56_v9 }
  0x95   :  { %214 = vmatpush.msra.mxu1 %v53_v7 }
  0x96   :  { %372 = vmatpush.msra.mxu2 %v53_v7 }
  0x9a   :  { %75 = vrot.lane.b32.xlu1 %v62_v10, %s1834_s22  ;;  %230 = vrot.lane.b32.xlu0 %v56_v9, %s1835_s23 }
  0x9b   :  { %234 = vrot.lane.b32.xlu2 %v62_v10, %s1835_s23 }
  0xa2   :  { %281 = vperm.xlu1 %1684, %v59_v8   ;;  %122 = vperm.xlu0 %1683, %v59_v8  }
  0xaa   :  { %285 = vperm.xlu1 %1684, %v62_v10  }
  0xb2   :  { %1686 = vset.pattern.permute.xlu1 %v1833_v6 }
  0xb3   :  { %126 = vperm.xlu1 %1686, %v62_v10  }
  0xdb   :  { %v274_v11 = vpop.permute.xlu2 %273 }
  0xe3   :  { %v72_v14 = vpop.permute.xlu2 %71 }
  0xed   :  { %v119_v21 = vpop.permute.xlu2 %118 }
  0xf3   :  { %v70_v12 = vpop.permute.xlu1 %69 }
  0xf4   :  { %v229_v13 = vpop.permute.xlu0 %228  ;;  %81 = vxpose.xlu0.b32.start [1/4] (short) (narrow) %v70_v12, 8 }
  0xf5   :  { %240 = vxpose.xlu2.b32.start [1/4] (short) (narrow) %v229_v13, 8  ;;  %v235_v22 = vpop.permute.xlu2 %234 }
  0xfb   :  { %v233_v15 = vpop.permute.xlu1 %232 }
  0xfc   :  { %v115_v16 = vpop.permute.xlu0 %114  ;;  %82 = vxpose.xlu0.b32.cont [2/4] (short) (narrow) %v72_v14, 8 }
 0x104   :  { %v74_v17 = vpop.permute.xlu0 %73  ;;  %v278_v18 = vpop.permute.xlu1 %277 }
 0x105   :  { %83 = vxpose.xlu0.b32.cont [3/4] (short) (narrow) %v74_v17, 8 }
 0x10c   :  { %v76_v19 = vpop.permute.xlu1 %75  ;;  %v231_v20 = vpop.permute.xlu0 %230 }
 0x10d   :  { %84 = vxpose.xlu0.b32.end [4/4] (short) (narrow) %v76_v19, 8  ;;  %241 = vxpose.xlu2.b32.cont [2/4] (short) (narrow) %v231_v20, 8 }
 0x114   :  { %v123_v23 = vpop.permute.xlu0 %122  ;;  %v282_v46 = vpop.permute.xlu1 %281 }
 0x115   :  { %242 = vxpose.xlu2.b32.cont [3/4] (short) (narrow) %v233_v15, 8 }
 0x11c   :  { %v286_v58 = vpop.permute.xlu1 %285 }
 0x11d   :  { %243 = vxpose.xlu2.b32.end [4/4] (short) (narrow) %v235_v22, 8 }
 0x125   :  { %v127_v0 = vpop.permute.xlu1 %126 }
 0x199   :  { %v97_v24 = vpop.trf.xlu0 }
 0x19a   :  { %v129_v25 = vperm.slane %v97_v24, 0 }
 0x19c   :  { %v131_v26 = vadd.f32 %v129_v25, %v119_v21  ;;  %v130_v27 = vadd.f32 %v129_v25, %v115_v16  ;;  %v132_v54 = vadd.f32 %v129_v25, %v123_v23  ;;  %v133_v3 = vadd.f32 %v129_v25, %v127_v0 }
 0x19e   :  { %v256_v30 = vpop.trf.xlu2  ;;  %vm135_vm1 = vcmp.ge.f32.partialorder %v131_v26, 0.0  ;;  %v139_v31 = vmul.f32 0.2, %v131_v26  ;;  %vm134_vm2 = vcmp.ge.f32.partialorder %v130_v27, 0.0  ;;  %v138_v32 = vmul.f32 0.2, %v130_v27 }
 0x19f   :  { %v288_v33 = vperm.slane %v256_v30, 0  ;;  %v140_v57 = vmul.f32 0.2, %v132_v54  ;;  %vm136_vm7 = vcmp.ge.f32.partialorder %v132_v54, 0.0  ;;  %v141_v6 = vmul.f32 0.2, %v133_v3 }
 0x1a0   :  { %v143_v34 = vsel %vm135_vm1, %v131_v26, %v139_v31  ;;  %v142_v35 = vsel %vm134_vm2, %v130_v27, %v138_v32  ;;  %vm137_vm9 = vcmp.ge.f32.partialorder %v133_v3, 0.0 }
 0x1a1   :  { %v147_v36 = vadd.f32 %v143_v34, %v1892_v28  ;;  %v146_v37 = vadd.f32 %v142_v35, %v1897_v29  ;;  %v289_v38 = vadd.f32 %v288_v33, %v274_v11  ;;  %v290_v39 = vadd.f32 %v288_v33, %v278_v18 }
 0x1a2   :  { %v291_v49 = vadd.f32 %v288_v33, %v282_v46  ;;  %v144_v60 = vsel %vm136_vm7, %v132_v54, %v140_v57  ;;  %v292_v61 = vadd.f32 %v288_v33, %v286_v58  ;;  %v145_v8 = vsel %vm137_vm9, %v133_v3, %v141_v6  ;;  %v436_v57 = vld [vmem:[%s2324_s2 + $0x40] sm:$0xff] }
 0x1a3   :  { %v154_v40 = vsel %vm150_vm3, %v147_v36, -inf  ;;  %v151_v41 = vsel %vm150_vm3, %v146_v37, -inf  ;;  %vm293_vm4 = vcmp.ge.f32.partialorder %v289_v38, 0.0  ;;  %v297_v42 = vmul.f32 0.2, %v289_v38 }
 0x1a4   :  { %155 = vmax.xlane.f32.xlu0 %v154_v40  ;;  %152 = vmax.xlane.f32.xlu2 %v151_v41  ;;  %v298_v44 = vmul.f32 0.2, %v290_v39  ;;  %vm294_vm5 = vcmp.ge.f32.partialorder %v290_v39, 0.0  ;;  %v299_v51 = vmul.f32 0.2, %v291_v49  ;;  %vm295_vm6 = vcmp.ge.f32.partialorder %v291_v49, 0.0 }
 0x1a5   :  { %v301_v43 = vsel %vm293_vm4, %v289_v38, %v297_v42  ;;  %v148_v62 = vadd.f32 %v144_v60, %v1910_v55  ;;  %v300_v63 = vmul.f32 0.2, %v292_v61  ;;  %vm296_vm8 = vcmp.ge.f32.partialorder %v292_v61, 0.0  ;;  %v434_v60 = vld [vmem:[%s2324_s2 + $0x20] sm:$0xff] }
 0x1a6   :  { %v305_v45 = vadd.f32 %v301_v43, %v1897_v29  ;;  %v302_v48 = vsel %vm294_vm5, %v290_v39, %v298_v44  ;;  %v303_v53 = vsel %vm295_vm6, %v291_v49, %v299_v51  ;;  %v149_v9 = vadd.f32 %v145_v8, %v1919_v4 }
 0x1a7   :  { %v306_v50 = vadd.f32 %v302_v48, %v1892_v28  ;;  %v307_v56 = vadd.f32 %v303_v53, %v1910_v55  ;;  %v157_v1 = vsel %vm150_vm3, %v148_v62, -inf  ;;  %v304_v2 = vsel %vm296_vm8, %v292_v61, %v300_v63 }
 0x1a8   :  { %v309_v47 = vsel %vm150_vm3, %v305_v45, -inf  ;;  %v308_v5 = vadd.f32 %v304_v2, %v1919_v4  ;;  %v160_v10 = vsel %vm150_vm3, %v149_v9, -inf  ;;  %v386_v54 = vlaneseq }
 0x1a9   :  { %310 = vmax.xlane.f32.xlu1 %v309_v47  ;;  %v312_v52 = vsel %vm150_vm3, %v306_v50, -inf  ;;  %v315_v59 = vsel %vm150_vm3, %v307_v56, -inf }
 0x1aa   :  { %v318_v7 = vsel %vm150_vm3, %v308_v5, -inf  ;;  %v1947_v58 = vand.u32 127, %v386_v54 }
 0x1ac   :  { %vm388_vm10 = vcmp.lt.s32.totalorder %v1947_v58, 16 }
 0x1b1   :  { %313 = vmax.xlane.f32.xlu1 %v312_v52 }
 0x1b9   :  { %316 = vmax.xlane.f32.xlu1 %v315_v59  ;;  %v435_v59 = vld [vmem:[%s2324_s2 + $0x30] sm:$0xff] }
 0x1c1   :  { %158 = vmax.xlane.f32.xlu1 %v157_v1 }
 0x1c9   :  { %319 = vmax.xlane.f32.xlu1 %v318_v7 }
 0x1d1   :  { %161 = vmax.xlane.f32.xlu1 %v160_v10 }
 0x217   :  { %v153_v11 = vpop.xlane.xlu2 %152  ;;  %v156_v13 = vpop.xlane.xlu0 %155 }
 0x218   :  { %v163_v12 = vsub.f32 %v146_v37, %v153_v11  ;;  %v164_v16 = vsub.f32 %v147_v36, %v156_v13 }
 0x21a   :  { %v167_v14 = vmul.f32 1.442695, %v163_v12  ;;  %v169_v19 = vmul.f32 1.442695, %v164_v16 }
 0x21c   :  { %v311_v15 = vpop.xlane.xlu1 %310  ;;  %1716 = vpow2.f32 %v167_v14 }
 0x21d   :  { %v321_v17 = vsub.f32 %v305_v45, %v311_v15 }
 0x21f   :  { %v325_v18 = vmul.f32 1.442695, %v321_v17 }
 0x221   :  { %1718 = vpow2.f32 %v325_v18 }
 0x222   :  { %v1717_v20 = vpop.eup %1716  ;;  %1720 = vpow2.f32 %v169_v19 }
 0x223   :  { %1620 = vmatmul.msk.f32.vlgmr.msra.gmra.mxu1 %vm150_vm3, %v1717_v20  ;;  %v175_v22 = vsel %vm150_vm3, %v1717_v20, 0.0 }
 0x224   :  { %v314_v21 = vpop.xlane.xlu1 %313  ;;  %176 = vadd.xlane.f32.xlu1 %v175_v22 }
 0x225   :  { %v322_v23 = vsub.f32 %v306_v50, %v314_v21 }
 0x227   :  { %v1719_v24 = vpop.eup %1718  ;;  %v327_v25 = vmul.f32 1.442695, %v322_v23 }
 0x228   :  { %1624 = vmatmul.msk.f32.vlgmr.msra.gmra.mxu2 %vm150_vm3, %v1719_v24  ;;  %v1721_v26 = vpop.eup %1720  ;;  %v333_v30 = vsel %vm150_vm3, %v1719_v24, 0.0 }
 0x229   :  { %1722 = vpow2.f32 %v327_v25  ;;  %v178_v35 = vsel %vm150_vm3, %v1721_v26, 0.0 }
 0x22b   :  { %1621 = vmatmul.msk.f32.gmra.mxu1 %vm150_vm3, %v1721_v26 }
 0x22c   :  { %v317_v27 = vpop.xlane.xlu1 %316  ;;  %334 = vadd.xlane.f32.xlu1 %v333_v30 }
 0x22d   :  { %v323_v31 = vsub.f32 %v307_v56, %v317_v27  ;;  %v437_v56 = vld [vmem:[%s2324_s2 + $0x50] sm:$0xff] }
 0x22e   :  { %462 = vmatpush.msrb.mxu3 %v437_v56 }
 0x22f   :  { %v1723_v32 = vpop.eup %1722  ;;  %v329_v33 = vmul.f32 1.442695, %v323_v31 }
 0x230   :  { %1625 = vmatmul.msk.f32.gmra.mxu2 %vm150_vm3, %v1723_v32  ;;  %v336_v40 = vsel %vm150_vm3, %v1723_v32, 0.0  ;;  %463 = vmatpush.msrb.mxu3 %v436_v57 }
 0x231   :  { %1724 = vpow2.f32 %v329_v33 }
 0x232   :  { %464 = vmatpush.msrb.mxu3 %v435_v59  ;;  %v1837_v59 = vmov 66  }
 0x233   :  { %1687 = vset.pattern.permute.xlu1 %v1837_v59  ;;  %1689 = vset.pattern.permute.xlu2 %v1837_v59 }
 0x234   :  { %v159_v34 = vpop.xlane.xlu1 %158  ;;  %179 = vadd.xlane.f32.xlu1 %v178_v35  ;;  %465 = vmatpush.msrb.mxu3 %v434_v60 }
 0x235   :  { %v165_v36 = vsub.f32 %v148_v62, %v159_v34 }
 0x237   :  { %v1725_v37 = vpop.eup %1724  ;;  %v171_v38 = vmul.f32 1.442695, %v165_v36 }
 0x238   :  { %1626 = vmatmul.msk.f32.gmra.mxu2 %vm150_vm3, %v1725_v37  ;;  %v339_v49 = vsel %vm150_vm3, %v1725_v37, 0.0 }
 0x239   :  { %1726 = vpow2.f32 %v171_v38  ;;  %v1836_v38 = vmov 67  }
 0x23a   :  { %1688 = vset.pattern.permute.xlu0 %v1836_v38 }
 0x23c   :  { %v320_v39 = vpop.xlane.xlu1 %319  ;;  %337 = vadd.xlane.f32.xlu1 %v336_v40 }
 0x23d   :  { %v324_v41 = vsub.f32 %v308_v5, %v320_v39  ;;  %v405_v5 = vld [vmem:[%s2324_s2 + $0x10] ss:$0 sm:$0xff] }
 0x23f   :  { %v1727_v42 = vpop.eup %1726  ;;  %v331_v43 = vmul.f32 1.442695, %v324_v41 }
 0x240   :  { %1622 = vmatmul.msk.f32.gmra.mxu1 %vm150_vm3, %v1727_v42  ;;  %v181_v45 = vsel %vm150_vm3, %v1727_v42, 0.0 }
 0x241   :  { %1728 = vpow2.f32 %v331_v43 }
 0x244   :  { %v162_v44 = vpop.xlane.xlu1 %161  ;;  %182 = vadd.xlane.f32.xlu1 %v181_v45 }
 0x245   :  { %v166_v46 = vsub.f32 %v149_v9, %v162_v44 }
 0x247   :  { %v1729_v47 = vpop.eup %1728  ;;  %v173_v48 = vmul.f32 1.442695, %v166_v46 }
 0x248   :  { %1627 = vmatmul.msk.f32.gmra.mxu2 %vm150_vm3, %v1729_v47  ;;  %v342_v52 = vsel %vm150_vm3, %v1729_v47, 0.0 }
 0x249   :  { %1730 = vpow2.f32 %v173_v48 }
 0x24c   :  { %340 = vadd.xlane.f32.xlu1 %v339_v49 }
 0x24f   :  { %v1731_v50 = vpop.eup %1730 }
 0x250   :  { %1623 = vmatmul.msk.f32.gmra.mxu1 %vm150_vm3, %v1731_v50  ;;  %v184_v51 = vsel %vm150_vm3, %v1731_v50, 0.0 }
 0x254   :  { %185 = vadd.xlane.f32.xlu1 %v184_v51 }
 0x25c   :  { %343 = vadd.xlane.f32.xlu1 %v342_v52 }
 0x297   :  { %v177_v53 = vpop.xlane.xlu1 %176 }
 0x29f   :  { %v335_v61 = vpop.xlane.xlu1 %334 }
 0x2a0   :  { %v393_v62 = vsel %vm388_vm10, %v177_v53, %v335_v61  ;;  %v216_v0 = vpop.f32.mrf.mxu1 }
 0x2a1   :  { %1732 = vrcp.f32 %v393_v62 }
 0x2a7   :  { %v180_v63 = vpop.xlane.xlu1 %179  ;;  %v1733_v2 = vpop.eup %1732 }
 0x2a8   :  { %v219_v13 = vpop.f32.mrf.mxu1 }
 0x2ab   :  { %v374_v1 = vpop.f32.mrf.mxu2 }
 0x2ac   :  { %v389_v3 = vsel %vm388_vm10, %v216_v0, %v374_v1 }
 0x2ad   :  { %v401_v6 = vmul.f32 %v1733_v2, %v389_v3 }
 0x2af   :  { %v406_v7 = vadd.f32 %v405_v5, %v401_v6  ;;  %v338_v8 = vpop.xlane.xlu1 %337 }
 0x2b0   :  { %v394_v10 = vsel %vm388_vm10, %v180_v63, %v338_v8 }
 0x2b1   :  { %v414_v9 = vmin.f32 %v406_v7, 0.0  ;;  %1734 = vrcp.f32 %v394_v10  ;;  %vm410_vm11 = vcmp.gt.f32.partialorder %v406_v7, 0.0 }
 0x2b3   :  { %v418_v11 = vmul.f32 1.442695, %v414_v9  ;;  %v377_v12 = vpop.f32.mrf.mxu2 }
 0x2b4   :  { %v390_v15 = vsel %vm388_vm10, %v219_v13, %v377_v12 }
 0x2b5   :  { %1736 = vpow2.f32 %v418_v11 }
 0x2b7   :  { %v1735_v14 = vpop.eup %1734  ;;  %v183_v16 = vpop.xlane.xlu1 %182 }
 0x2b8   :  { %v402_v17 = vmul.f32 %v1735_v14, %v390_v15 }
 0x2ba   :  { %v407_v19 = vadd.f32 %v405_v5, %v402_v17 }
 0x2bb   :  { %v1737_v18 = vpop.eup %1736  ;;  %v380_v30 = vpop.f32.mrf.mxu2 }
 0x2bc   :  { %v1628_v20 = vadd.f32 -1.0, %v1737_v18  ;;  %v415_v21 = vmin.f32 %v407_v19, 0.0  ;;  %vm411_vm12 = vcmp.gt.f32.partialorder %v407_v19, 0.0 }
 0x2bd   :  { %v222_v26 = vpop.f32.mrf.mxu1 }
 0x2be   :  { %v430_v22 = vsel %vm410_vm11, %v406_v7, %v1628_v20  ;;  %v420_v23 = vmul.f32 1.442695, %v415_v21  ;;  %v391_v32 = vsel %vm388_vm10, %v222_v26, %v380_v30 }
 0x2bf   :  { %1632 = vmatmul.msk.f32.vlgmr.msrb.gmra.mxu3 %vm150_vm3, %v430_v22  ;;  %v341_v24 = vpop.xlane.xlu1 %340 }
 0x2c0   :  { %v395_v25 = vsel %vm388_vm10, %v183_v16, %v341_v24  ;;  %1738 = vpow2.f32 %v420_v23 }
 0x2c1   :  { %1740 = vrcp.f32 %v395_v25 }
 0x2c6   :  { %v1739_v27 = vpop.eup %1738 }
 0x2c7   :  { %v1741_v31 = vpop.eup %1740  ;;  %v186_v33 = vpop.xlane.xlu1 %185  ;;  %v1629_v34 = vadd.f32 -1.0, %v1739_v27 }
 0x2c8   :  { %v403_v35 = vmul.f32 %v1741_v31, %v391_v32 }
 0x2c9   :  { %v431_v36 = vsel %vm411_vm12, %v407_v19, %v1629_v34 }
 0x2ca   :  { %1633 = vmatmul.msk.f32.gmra.mxu3 %vm150_vm3, %v431_v36  ;;  %v408_v37 = vadd.f32 %v405_v5, %v403_v35 }
 0x2cb   :  { %v383_v45 = vpop.f32.mrf.mxu2 }
 0x2cc   :  { %v416_v39 = vmin.f32 %v408_v37, 0.0  ;;  %vm412_vm13 = vcmp.gt.f32.partialorder %v408_v37, 0.0 }
 0x2cd   :  { %v225_v43 = vpop.f32.mrf.mxu1 }
 0x2ce   :  { %v422_v40 = vmul.f32 1.442695, %v416_v39  ;;  %v392_v47 = vsel %vm388_vm10, %v225_v43, %v383_v45 }
 0x2cf   :  { %v344_v41 = vpop.xlane.xlu1 %343 }
 0x2d0   :  { %v396_v42 = vsel %vm388_vm10, %v186_v33, %v344_v41  ;;  %1742 = vpow2.f32 %v422_v40 }
 0x2d1   :  { %1744 = vrcp.f32 %v396_v42 }
 0x2d6   :  { %v1743_v44 = vpop.eup %1742 }
 0x2d7   :  { %v1745_v46 = vpop.eup %1744  ;;  %v1630_v48 = vadd.f32 -1.0, %v1743_v44 }
 0x2d8   :  { %v404_v49 = vmul.f32 %v1745_v46, %v392_v47 }
 0x2d9   :  { %v432_v50 = vsel %vm412_vm13, %v408_v37, %v1630_v48 }
 0x2da   :  { %1634 = vmatmul.msk.f32.gmra.mxu3 %vm150_vm3, %v432_v50  ;;  %v409_v51 = vadd.f32 %v405_v5, %v404_v49 }
 0x2dc   :  { %v417_v52 = vmin.f32 %v409_v51, 0.0  ;;  %vm413_vm14 = vcmp.gt.f32.partialorder %v409_v51, 0.0 }
 0x2de   :  { %v424_v53 = vmul.f32 1.442695, %v417_v52 }
 0x2e0   :  { %1746 = vpow2.f32 %v424_v53 }
 0x2e6   :  { %v1747_v54 = vpop.eup %1746 }
 0x2e7   :  { %v1631_v56 = vadd.f32 -1.0, %v1747_v54 }
 0x2e9   :  { %v433_v57 = vsel %vm413_vm14, %v409_v51, %v1631_v56 }
 0x2ea   :  { %1635 = vmatmul.msk.f32.gmra.mxu3 %vm150_vm3, %v433_v57 }
 0x342   :  { %v1979_v60 = vpop.f32.mrf.mxu3 }
 0x343   :  { %686 = vperm.xlu0 %1688, %v1979_v60   ;;  %641 = vrot.lane.b32.xlu2 %v1979_v60, %s1838_s14 }
 0x344   :  { %483 = vrot.lane.b32.xlu1 %v1979_v60, %s1839_s15 }
 0x34c   :  { %528 = vperm.xlu1 %1687, %v1979_v60  }
 0x34d   :  { %v1985_v61 = vpop.f32.mrf.mxu3 }
 0x34e   :  { %532 = vperm.xlu2 %1689, %v1985_v61   ;;  %485 = vrot.lane.b32.xlu0 %v1985_v61, %s1839_s15 }
 0x354   :  { %643 = vrot.lane.b32.xlu1 %v1985_v61, %s1838_s14 }
 0x355   :  { %1690 = vset.pattern.permute.xlu1 %v1836_v38 }
 0x35d   :  { %v1990_v62 = vpop.f32.mrf.mxu3 }
 0x35e   :  { %645 = vrot.lane.b32.xlu1 %v1990_v62, %s1838_s14  ;;  %487 = vrot.lane.b32.xlu2 %v1990_v62, %s1839_s15 }
 0x366   :  { %690 = vperm.xlu1 %1690, %v1985_v61   ;;  %536 = vperm.xlu2 %1689, %v1990_v62  }
 0x36d   :  { %v1996_v63 = vpop.f32.mrf.mxu3 }
 0x36e   :  { %694 = vperm.xlu1 %1690, %v1990_v62   ;;  %647 = vrot.lane.b32.xlu2 %v1996_v63, %s1838_s14 }
 0x36f   :  { %489 = vrot.lane.b32.xlu0 %v1996_v63, %s1839_s15  ;;  %624 = vmatpush.msrb.mxu0 %v1996_v63 }
 0x370   :  { %782 = vmatpush.msrb.mxu1 %v1996_v63 }
 0x371   :  { %625 = vmatpush.msrb.mxu0 %v1990_v62 }
 0x372   :  { %783 = vmatpush.msrb.mxu1 %v1990_v62 }
 0x373   :  { %626 = vmatpush.msrb.mxu0 %v1985_v61 }
 0x374   :  { %784 = vmatpush.msrb.mxu1 %v1985_v61 }
 0x375   :  { %627 = vmatpush.msrb.mxu0 %v1979_v60 }
 0x376   :  { %785 = vmatpush.msrb.mxu1 %v1979_v60  ;;  %1691 = vset.pattern.permute.xlu1 %v1837_v59 }
 0x377   :  { %540 = vperm.xlu1 %1691, %v1996_v63  }
 0x37f   :  { %1692 = vset.pattern.permute.xlu1 %v1836_v38 }
 0x380   :  { %698 = vperm.xlu1 %1692, %v1996_v63  }
 0x39d   :  { %v642_v0 = vpop.permute.xlu2 %641 }
 0x39e   :  { %653 = vxpose.xlu2.b32.start [1/4] (short) (narrow) %v642_v0, 8 }
 0x3a8   :  { %v533_v3 = vpop.permute.xlu2 %532 }
 0x3b5   :  { %v687_v2 = vpop.permute.xlu0 %686 }
 0x3b6   :  { %v484_v1 = vpop.permute.xlu1 %483 }
 0x3b7   :  { %495 = vxpose.xlu0.b32.start [1/4] (short) (narrow) %v484_v1, 8 }
 0x3b8   :  { %v488_v7 = vpop.permute.xlu2 %487 }
 0x3be   :  { %v529_v5 = vpop.permute.xlu1 %528 }
 0x3c0   :  { %v486_v6 = vpop.permute.xlu0 %485  ;;  %v537_v9 = vpop.permute.xlu2 %536 }
 0x3c1   :  { %496 = vxpose.xlu0.b32.cont [2/4] (short) (narrow) %v486_v6, 8 }
 0x3c6   :  { %v644_v8 = vpop.permute.xlu1 %643 }
 0x3c7   :  { %654 = vxpose.xlu2.b32.cont [2/4] (short) (narrow) %v644_v8, 8 }
 0x3c8   :  { %v648_v11 = vpop.permute.xlu2 %647 }
 0x3c9   :  { %497 = vxpose.xlu0.b32.cont [3/4] (short) (narrow) %v488_v7, 8 }
 0x3d0   :  { %v646_v10 = vpop.permute.xlu1 %645 }
 0x3d1   :  { %655 = vxpose.xlu2.b32.cont [3/4] (short) (narrow) %v646_v10, 8 }
 0x3d8   :  { %v691_v15 = vpop.permute.xlu1 %690 }
 0x3d9   :  { %656 = vxpose.xlu2.b32.end [4/4] (short) (narrow) %v648_v11, 8 }
 0x3e0   :  { %v695_v39 = vpop.permute.xlu1 %694 }
 0x3e1   :  { %v490_v12 = vpop.permute.xlu0 %489 }
 0x3e2   :  { %498 = vxpose.xlu0.b32.end [4/4] (short) (narrow) %v490_v12, 8 }
 0x3e9   :  { %v541_v46 = vpop.permute.xlu1 %540 }
 0x3f2   :  { %v699_v51 = vpop.permute.xlu1 %698 }
 0x45a   :  { %v669_v13 = vpop.trf.xlu2 }
 0x45b   :  { %v701_v14 = vperm.slane %v669_v13, 0 }
 0x45d   :  { %v703_v16 = vadd.f32 %v701_v14, %v691_v15  ;;  %v702_v17 = vadd.f32 %v701_v14, %v687_v2  ;;  %v704_v44 = vadd.f32 %v701_v14, %v695_v39  ;;  %v705_v54 = vadd.f32 %v701_v14, %v699_v51 }
 0x45f   :  { %vm707_vm15 = vcmp.ge.f32.partialorder %v703_v16, 0.0  ;;  %v711_v18 = vmul.f32 0.2, %v703_v16  ;;  %vm706_vm0 = vcmp.ge.f32.partialorder %v702_v17, 0.0  ;;  %v710_v19 = vmul.f32 0.2, %v702_v17 }
 0x460   :  { %v712_v45 = vmul.f32 0.2, %v704_v44  ;;  %vm708_vm5 = vcmp.ge.f32.partialorder %v704_v44, 0.0  ;;  %v713_v57 = vmul.f32 0.2, %v705_v54  ;;  %vm709_vm7 = vcmp.ge.f32.partialorder %v705_v54, 0.0 }
 0x461   :  { %v715_v20 = vsel %vm707_vm15, %v703_v16, %v711_v18  ;;  %v714_v21 = vsel %vm706_vm0, %v702_v17, %v710_v19 }
 0x462   :  { %v719_v22 = vadd.f32 %v715_v20, %v1892_v28  ;;  %v718_v23 = vadd.f32 %v714_v21, %v1897_v29  ;;  %v716_v47 = vsel %vm708_vm5, %v704_v44, %v712_v45  ;;  %v862_v44 = vld [vmem:[%s2324_s2 + $0x90] sm:$0xff]  ;;  %vm1225_vm5 = vcmp.lt.s32.totalorder %v1947_v58, 4 }
 0x463   :  { %v720_v49 = vadd.f32 %v716_v47, %v1910_v55 }
 0x464   :  { %v725_v24 = vsel %vm150_vm3, %v719_v22, -inf  ;;  %v722_v25 = vsel %vm150_vm3, %v718_v23, -inf }
 0x465   :  { %726 = vmax.xlane.f32.xlu2 %v725_v24  ;;  %723 = vmax.xlane.f32.xlu0 %v722_v25  ;;  %v728_v52 = vsel %vm150_vm3, %v720_v49, -inf }
 0x46e   :  { %v511_v26 = vpop.trf.xlu0 }
 0x46f   :  { %v543_v27 = vperm.slane %v511_v26, 0 }
 0x471   :  { %v544_v30 = vadd.f32 %v543_v27, %v529_v5  ;;  %v545_v31 = vadd.f32 %v543_v27, %v533_v3  ;;  %v546_v38 = vadd.f32 %v543_v27, %v537_v9  ;;  %v547_v48 = vadd.f32 %v543_v27, %v541_v46 }
 0x473   :  { %vm548_vm1 = vcmp.ge.f32.partialorder %v544_v30, 0.0  ;;  %v552_v32 = vmul.f32 0.2, %v544_v30  ;;  %v553_v34 = vmul.f32 0.2, %v545_v31  ;;  %vm549_vm2 = vcmp.ge.f32.partialorder %v545_v31, 0.0 }
 0x474   :  { %v554_v41 = vmul.f32 0.2, %v546_v38  ;;  %vm550_vm4 = vcmp.ge.f32.partialorder %v546_v38, 0.0  ;;  %v555_v50 = vmul.f32 0.2, %v547_v48  ;;  %vm551_vm6 = vcmp.ge.f32.partialorder %v547_v48, 0.0 }
 0x475   :  { %v556_v33 = vsel %vm548_vm1, %v544_v30, %v552_v32  ;;  %v557_v37 = vsel %vm549_vm2, %v545_v31, %v553_v34 }
 0x476   :  { %v560_v35 = vadd.f32 %v556_v33, %v1897_v29  ;;  %v561_v40 = vadd.f32 %v557_v37, %v1892_v28  ;;  %v558_v43 = vsel %vm550_vm4, %v546_v38, %v554_v41  ;;  %v559_v53 = vsel %vm551_vm6, %v547_v48, %v555_v50 }
 0x477   :  { %v562_v29 = vadd.f32 %v558_v43, %v1910_v55  ;;  %v563_v56 = vadd.f32 %v559_v53, %v1919_v4  ;;  %v863_v43 = vld [vmem:[%s2324_s2 + $0xa0] sm:$0xff] }
 0x478   :  { %v564_v36 = vsel %vm150_vm3, %v560_v35, -inf  ;;  %v567_v42 = vsel %vm150_vm3, %v561_v40, -inf  ;;  %888 = vmatpush.msrb.mxu2 %v863_v43 }
 0x479   :  { %565 = vmax.xlane.f32.xlu1 %v564_v36  ;;  %v570_v28 = vsel %vm150_vm3, %v562_v29, -inf  ;;  %v573_v59 = vsel %vm150_vm3, %v563_v56, -inf }
 0x47a   :  { %889 = vmatpush.msrb.mxu2 %v862_v44 }
 0x47d   :  { %817 = vrot.lane.b32.xlu2 %v1985_v61, %s1834_s22  ;;  %v717_v61 = vsel %vm709_vm7, %v705_v54, %v713_v57 }
 0x481   :  { %568 = vmax.xlane.f32.xlu1 %v567_v42 }
 0x485   :  { %821 = vrot.lane.b32.xlu2 %v1996_v63, %s1834_s22  ;;  %v721_v63 = vadd.f32 %v717_v61, %v1919_v4 }
 0x487   :  { %v731_v55 = vsel %vm150_vm3, %v721_v63, -inf }
 0x489   :  { %571 = vmax.xlane.f32.xlu1 %v570_v28 }
 0x491   :  { %729 = vmax.xlane.f32.xlu1 %v728_v52  ;;  %v831_v52 = vld [vmem:[%s2324_s2 + $0x60] ss:$0 sm:$0xff] }
 0x499   :  { %574 = vmax.xlane.f32.xlu1 %v573_v59 }
 0x4a1   :  { %732 = vmax.xlane.f32.xlu1 %v731_v55 }
 0x4ba   :  { %815 = vrot.lane.b32.xlu1 %v1979_v60, %s1834_s22 }
 0x4d8   :  { %v724_v0 = vpop.xlane.xlu0 %723  ;;  %v727_v2 = vpop.xlane.xlu2 %726 }
 0x4d9   :  { %v734_v1 = vsub.f32 %v718_v23, %v724_v0  ;;  %v735_v5 = vsub.f32 %v719_v22, %v727_v2 }
 0x4db   :  { %v738_v3 = vmul.f32 1.442695, %v734_v1  ;;  %v740_v6 = vmul.f32 1.442695, %v735_v5 }
 0x4dd   :  { %1748 = vpow2.f32 %v738_v3 }
 0x4de   :  { %1750 = vpow2.f32 %v740_v6 }
 0x4e3   :  { %v1749_v7 = vpop.eup %1748 }
 0x4e4   :  { %1640 = vmatmul.msk.f32.vlgmr.msrb.gmra.mxu1 %vm150_vm3, %v1749_v7  ;;  %v1751_v8 = vpop.eup %1750  ;;  %v746_v19 = vsel %vm150_vm3, %v1749_v7, 0.0  ;;  %v818_v7 = vpop.permute.xlu2 %817 }
 0x4e5   :  { %v749_v32 = vsel %vm150_vm3, %v1751_v8, 0.0 }
 0x4ec   :  { %v566_v9 = vpop.xlane.xlu1 %565  ;;  %1641 = vmatmul.msk.f32.gmra.mxu1 %vm150_vm3, %v1751_v8 }
 0x4ed   :  { %v576_v4 = vsub.f32 %v560_v35, %v566_v9 }
 0x4ef   :  { %v580_v10 = vmul.f32 1.442695, %v576_v4 }
 0x4f1   :  { %1752 = vpow2.f32 %v580_v10 }
 0x4f4   :  { %v569_v11 = vpop.xlane.xlu1 %568 }
 0x4f5   :  { %v577_v60 = vsub.f32 %v561_v40, %v569_v11 }
 0x4f7   :  { %v1753_v12 = vpop.eup %1752  ;;  %v582_v13 = vmul.f32 1.442695, %v577_v60 }
 0x4f8   :  { %1636 = vmatmul.msk.f32.vlgmr.msrb.gmra.mxu0 %vm150_vm3, %v1753_v12  ;;  %v588_v14 = vsel %vm150_vm3, %v1753_v12, 0.0 }
 0x4f9   :  { %1754 = vpow2.f32 %v582_v13  ;;  %589 = vadd.xlane.f32.xlu1 %v588_v14 }
 0x4fc   :  { %v572_v15 = vpop.xlane.xlu1 %571 }
 0x4fd   :  { %v578_v16 = vsub.f32 %v562_v29, %v572_v15  ;;  %v861_v29 = vld [vmem:[%s2324_s2 + $0x80] sm:$0xff] }
 0x4fe   :  { %890 = vmatpush.msrb.mxu2 %v861_v29 }
 0x4ff   :  { %v1755_v17 = vpop.eup %1754  ;;  %v584_v18 = vmul.f32 1.442695, %v578_v16 }
 0x500   :  { %1637 = vmatmul.msk.f32.gmra.mxu0 %vm150_vm3, %v1755_v17  ;;  %v591_v24 = vsel %vm150_vm3, %v1755_v17, 0.0 }
 0x501   :  { %1756 = vpow2.f32 %v584_v18  ;;  %747 = vadd.xlane.f32.xlu1 %v746_v19 }
 0x504   :  { %v730_v20 = vpop.xlane.xlu1 %729 }
 0x505   :  { %v736_v21 = vsub.f32 %v720_v49, %v730_v20 }
 0x507   :  { %v1757_v22 = vpop.eup %1756  ;;  %v742_v23 = vmul.f32 1.442695, %v736_v21 }
 0x508   :  { %1638 = vmatmul.msk.f32.gmra.mxu0 %vm150_vm3, %v1757_v22  ;;  %v594_v38 = vsel %vm150_vm3, %v1757_v22, 0.0 }
 0x509   :  { %1758 = vpow2.f32 %v742_v23  ;;  %592 = vadd.xlane.f32.xlu1 %v591_v24 }
 0x50c   :  { %v575_v25 = vpop.xlane.xlu1 %574 }
 0x50d   :  { %v579_v26 = vsub.f32 %v563_v56, %v575_v25 }
 0x50f   :  { %v1759_v27 = vpop.eup %1758  ;;  %v586_v30 = vmul.f32 1.442695, %v579_v26 }
 0x510   :  { %1642 = vmatmul.msk.f32.gmra.mxu1 %vm150_vm3, %v1759_v27  ;;  %v752_v31 = vsel %vm150_vm3, %v1759_v27, 0.0  ;;  %v822_v27 = vpop.permute.xlu2 %821 }
 0x511   :  { %1760 = vpow2.f32 %v586_v30  ;;  %753 = vadd.xlane.f32.xlu0 %v752_v31  ;;  %750 = vadd.xlane.f32.xlu1 %v749_v32 }
 0x514   :  { %v733_v33 = vpop.xlane.xlu1 %732 }
 0x515   :  { %v737_v34 = vsub.f32 %v721_v63, %v733_v33 }
 0x517   :  { %v1761_v35 = vpop.eup %1760  ;;  %v744_v36 = vmul.f32 1.442695, %v737_v34 }
 0x518   :  { %1639 = vmatmul.msk.f32.gmra.mxu0 %vm150_vm3, %v1761_v35  ;;  %v597_v37 = vsel %vm150_vm3, %v1761_v35, 0.0 }
 0x519   :  { %1762 = vpow2.f32 %v744_v36  ;;  %598 = vadd.xlane.f32.xlu0 %v597_v37  ;;  %595 = vadd.xlane.f32.xlu1 %v594_v38 }
 0x51f   :  { %v1763_v39 = vpop.eup %1762 }
 0x520   :  { %1643 = vmatmul.msk.f32.gmra.mxu1 %vm150_vm3, %v1763_v39  ;;  %v755_v40 = vsel %vm150_vm3, %v1763_v39, 0.0 }
 0x521   :  { %756 = vadd.xlane.f32.xlu0 %v755_v40 }
 0x52c   :  { %v816_v41 = vpop.permute.xlu1 %815 }
 0x535   :  { %819 = vrot.lane.b32.xlu0 %v1990_v62, %s1834_s22  ;;  %v860_v62 = vld [vmem:[%s2324_s2 + $0x70] sm:$0xff] }
 0x536   :  { %891 = vmatpush.msrb.mxu2 %v860_v62 }
 0x561   :  { %v787_v47 = vpop.f32.mrf.mxu1 }
 0x569   :  { %v790_v0 = vpop.f32.mrf.mxu1 }
 0x56c   :  { %v590_v42 = vpop.xlane.xlu1 %589 }
 0x574   :  { %v748_v45 = vpop.xlane.xlu1 %747 }
 0x575   :  { %v803_v46 = vsel %vm388_vm10, %v590_v42, %v748_v45  ;;  %v629_v28 = vpop.f32.mrf.mxu0  ;;  %v1840_v45 = vmov 19  }
 0x576   :  { %1764 = vrcp.f32 %v803_v46  ;;  %v799_v49 = vsel %vm388_vm10, %v629_v28, %v787_v47  ;;  %1694 = vset.pattern.permute.xlu1 %v1840_v45  ;;  %v1841_v46 = vmov 18  }
 0x577   :  { %1693 = vset.pattern.permute.xlu2 %v1841_v46  ;;  %1695 = vset.pattern.permute.xlu0 %v1841_v46 }
 0x57c   :  { %v1765_v48 = vpop.eup %1764  ;;  %v593_v50 = vpop.xlane.xlu1 %592 }
 0x57d   :  { %v811_v51 = vmul.f32 %v1765_v48, %v799_v49  ;;  %v632_v55 = vpop.f32.mrf.mxu0 }
 0x57e   :  { %v800_v2 = vsel %vm388_vm10, %v632_v55, %v790_v0 }
 0x57f   :  { %v827_v53 = vadd.f32 %v816_v41, %v811_v51 }
 0x581   :  { %v832_v54 = vadd.f32 %v831_v52, %v827_v53 }
 0x583   :  { %v840_v56 = vmin.f32 %v832_v54, 0.0  ;;  %vm836_vm8 = vcmp.gt.f32.partialorder %v832_v54, 0.0 }
 0x584   :  { %v751_v57 = vpop.xlane.xlu1 %750  ;;  %v754_v59 = vpop.xlane.xlu0 %753 }
 0x585   :  { %v804_v61 = vsel %vm388_vm10, %v593_v50, %v751_v57  ;;  %v844_v63 = vmul.f32 1.442695, %v840_v56  ;;  %v635_v12 = vpop.f32.mrf.mxu0 }
 0x586   :  { %1766 = vrcp.f32 %v804_v61 }
 0x587   :  { %1768 = vpow2.f32 %v844_v63 }
 0x58c   :  { %v1767_v1 = vpop.eup %1766  ;;  %v599_v3 = vpop.xlane.xlu0 %598 }
 0x58d   :  { %v1769_v5 = vpop.eup %1768  ;;  %v812_v6 = vmul.f32 %v1767_v1, %v800_v2  ;;  %v793_v13 = vpop.f32.mrf.mxu1 }
 0x58e   :  { %v1644_v8 = vadd.f32 -1.0, %v1769_v5  ;;  %v596_v16 = vpop.xlane.xlu1 %595  ;;  %v801_v31 = vsel %vm388_vm10, %v635_v12, %v793_v13  ;;  %v1829_v13 = vld [vmem:[%s2326_s1 + $0x10] sm:$0xff] }
 0x58f   :  { %v828_v9 = vadd.f32 %v818_v7, %v812_v6  ;;  %v805_v17 = vsel %vm388_vm10, %v596_v16, %v754_v59 }
 0x590   :  { %v856_v4 = vsel %vm836_vm8, %v832_v54, %v1644_v8 }
 0x591   :  { %1648 = vmatmul.msk.f32.vlgmr.msrb.gmra.mxu2 %vm150_vm3, %v856_v4  ;;  %v833_v10 = vadd.f32 %v831_v52, %v828_v9 }
 0x593   :  { %v841_v11 = vmin.f32 %v833_v10, 0.0  ;;  %vm837_vm9 = vcmp.gt.f32.partialorder %v833_v10, 0.0 }
 0x594   :  { %v757_v60 = vpop.xlane.xlu0 %756 }
 0x595   :  { %v846_v14 = vmul.f32 1.442695, %v841_v11  ;;  %v806_v15 = vsel %vm388_vm10, %v599_v3, %v757_v60  ;;  %v638_v19 = vpop.f32.mrf.mxu0  ;;  %v1828_v60 = vld [vmem:[%s2326_s1] sm:$0xff] }
 0x597   :  { %1770 = vpow2.f32 %v846_v14 }
 0x598   :  { %1772 = vrcp.f32 %v806_v15 }
 0x599   :  { %1774 = vrcp.f32 %v805_v17 }
 0x59d   :  { %v1771_v18 = vpop.eup %1770  ;;  %v796_v20 = vpop.f32.mrf.mxu1 }
 0x59e   :  { %v802_v21 = vsel %vm388_vm10, %v638_v19, %v796_v20  ;;  %v1645_v22 = vadd.f32 -1.0, %v1771_v18  ;;  %v1773_v23 = vpop.eup %1772  ;;  %v1830_v19 = vld [vmem:[%s2326_s1 + $0x8] sm:$0xff] }
 0x59f   :  { %v814_v24 = vmul.f32 %v1773_v23, %v802_v21  ;;  %v1775_v26 = vpop.eup %1774 }
 0x5a0   :  { %v857_v25 = vsel %vm837_vm9, %v833_v10, %v1645_v22  ;;  %v813_v32 = vmul.f32 %v1775_v26, %v801_v31 }
 0x5a1   :  { %1649 = vmatmul.msk.f32.gmra.mxu2 %vm150_vm3, %v857_v25  ;;  %v830_v30 = vadd.f32 %v822_v27, %v814_v24 }
 0x5a3   :  { %v835_v35 = vadd.f32 %v831_v52, %v830_v30 }
 0x5a5   :  { %v843_v38 = vmin.f32 %v835_v35, 0.0  ;;  %vm839_vm10 = vcmp.gt.f32.partialorder %v835_v35, 0.0 }
 0x5a7   :  { %v820_v33 = vpop.permute.xlu0 %819  ;;  %v850_v40 = vmul.f32 1.442695, %v843_v38 }
 0x5a8   :  { %v829_v34 = vadd.f32 %v820_v33, %v813_v32 }
 0x5aa   :  { %v834_v36 = vadd.f32 %v831_v52, %v829_v34 }
 0x5ac   :  { %v842_v37 = vmin.f32 %v834_v36, 0.0  ;;  %vm838_vm11 = vcmp.gt.f32.partialorder %v834_v36, 0.0 }
 0x5ae   :  { %v848_v39 = vmul.f32 1.442695, %v842_v37 }
 0x5b0   :  { %1776 = vpow2.f32 %v848_v39 }
 0x5b1   :  { %1778 = vpow2.f32 %v850_v40 }
 0x5b6   :  { %v1777_v41 = vpop.eup %1776 }
 0x5b7   :  { %v1646_v42 = vadd.f32 -1.0, %v1777_v41  ;;  %v1779_v44 = vpop.eup %1778 }
 0x5b8   :  { %v1647_v29 = vadd.f32 -1.0, %v1779_v44 }
 0x5b9   :  { %v858_v43 = vsel %vm838_vm11, %v834_v36, %v1646_v42 }
 0x5ba   :  { %1650 = vmatmul.msk.f32.gmra.mxu2 %vm150_vm3, %v858_v43  ;;  %v859_v62 = vsel %vm839_vm10, %v835_v35, %v1647_v29 }
 0x5c2   :  { %1651 = vmatmul.msk.f32.gmra.mxu2 %vm150_vm3, %v859_v62 }
 0x614   :  { %v2086_v28 = vpop.f32.mrf.mxu2 }
 0x615   :  { %1067 = vrot.lane.b32.xlu2 %v2086_v28, %s1842_s25  ;;  %909 = vrot.lane.b32.xlu1 %v2086_v28, %s1843_s26 }
 0x61d   :  { %954 = vperm.xlu2 %1693, %v2086_v28   ;;  %1112 = vperm.xlu1 %1694, %v2086_v28  }
 0x624   :  { %v2092_v47 = vpop.f32.mrf.mxu2 }
 0x625   :  { %958 = vperm.xlu0 %1695, %v2092_v47   ;;  %911 = vrot.lane.b32.xlu2 %v2092_v47, %s1843_s26 }
 0x626   :  { %1696 = vset.pattern.permute.xlu2 %v1840_v45  ;;  %1697 = vset.pattern.permute.xlu1 %v1841_v46 }
 0x62d   :  { %1069 = vrot.lane.b32.xlu2 %v2092_v47, %s1842_s25 }
 0x635   :  { %1116 = vperm.xlu2 %1696, %v2092_v47  }
 0x63d   :  { %v2098_v48 = vpop.f32.mrf.mxu2 }
 0x63e   :  { %1071 = vrot.lane.b32.xlu1 %v2098_v48, %s1842_s25  ;;  %913 = vrot.lane.b32.xlu0 %v2098_v48, %s1843_s26 }
 0x645   :  { %v2102_v49 = vpop.f32.mrf.mxu2 }
 0x646   :  { %962 = vperm.xlu1 %1697, %v2098_v48   ;;  %915 = vrot.lane.b32.xlu0 %v2102_v49, %s1843_s26 }
 0x647   :  { %1050 = vmatpush.msra.mxu3 %v2102_v49  ;;  %1208 = vmatpush.msra.mxu0 %v2102_v49 }
 0x649   :  { %1051 = vmatpush.msra.mxu3 %v2098_v48  ;;  %1209 = vmatpush.msra.mxu0 %v2098_v48 }
 0x64b   :  { %1052 = vmatpush.msra.mxu3 %v2092_v47  ;;  %1210 = vmatpush.msra.mxu0 %v2092_v47 }
 0x64d   :  { %1053 = vmatpush.msra.mxu3 %v2086_v28  ;;  %1211 = vmatpush.msra.mxu0 %v2086_v28 }
 0x64e   :  { %1698 = vset.pattern.permute.xlu1 %v1840_v45  ;;  %1073 = vrot.lane.b32.xlu0 %v2102_v49, %s1842_s25 }
 0x64f   :  { %1120 = vperm.xlu1 %1698, %v2098_v48  }
 0x656   :  { %966 = vperm.xlu0 %1695, %v2102_v49  }
 0x65e   :  { %1699 = vset.pattern.permute.xlu0 %v1840_v45  ;;  %v1831_v45 = vld [vmem:[%s2326_s1 + $0x18] sm:$0xff] }
 0x65f   :  { %1124 = vperm.xlu0 %1699, %v2102_v49  }
 0x66f   :  { %v1068_v50 = vpop.permute.xlu2 %1067 }
 0x677   :  { %v955_v51 = vpop.permute.xlu2 %954 }
 0x67f   :  { %v912_v52 = vpop.permute.xlu2 %911 }
 0x684   :  { %1079 = vxpose.xlu1.b32.start [1/4] (short) (narrow) %v1068_v50, 8 }
 0x687   :  { %v910_v53 = vpop.permute.xlu1 %909  ;;  %v1070_v54 = vpop.permute.xlu2 %1069 }
 0x688   :  { %921 = vxpose.xlu2.b32.start [1/4] (short) (narrow) %v910_v53, 8 }
 0x68c   :  { %1080 = vxpose.xlu1.b32.cont [2/4] (short) (narrow) %v1070_v54, 8 }
 0x68f   :  { %v1113_v56 = vpop.permute.xlu1 %1112  ;;  %v1117_v0 = vpop.permute.xlu2 %1116 }
 0x690   :  { %922 = vxpose.xlu2.b32.cont [2/4] (short) (narrow) %v912_v52, 8 }
 0x697   :  { %v959_v57 = vpop.permute.xlu0 %958 }
 0x6b0   :  { %v1072_v59 = vpop.permute.xlu1 %1071  ;;  %v914_v61 = vpop.permute.xlu0 %913 }
 0x6b1   :  { %1081 = vxpose.xlu1.b32.cont [3/4] (short) (narrow) %v1072_v59, 8  ;;  %923 = vxpose.xlu2.b32.cont [3/4] (short) (narrow) %v914_v61, 8 }
 0x6b8   :  { %v916_v63 = vpop.permute.xlu0 %915  ;;  %v963_v2 = vpop.permute.xlu1 %962 }
 0x6b9   :  { %924 = vxpose.xlu2.b32.end [4/4] (short) (narrow) %v916_v63, 8 }
 0x6c0   :  { %v1074_v55 = vpop.permute.xlu0 %1073 }
 0x6c1   :  { %1082 = vxpose.xlu1.b32.end [4/4] (short) (narrow) %v1074_v55, 8  ;;  %v1121_v17 = vpop.permute.xlu1 %1120 }
 0x6c8   :  { %v967_v34 = vpop.permute.xlu0 %966 }
 0x6d1   :  { %v1125_v43 = vpop.permute.xlu0 %1124 }
 0x73a   :  { %v937_v1 = vpop.trf.xlu2 }
 0x73b   :  { %v969_v3 = vperm.slane %v937_v1, 0 }
 0x73d   :  { %v970_v5 = vadd.f32 %v969_v3, %v955_v51  ;;  %v972_v6 = vadd.f32 %v969_v3, %v963_v2  ;;  %v971_v7 = vadd.f32 %v969_v3, %v959_v57  ;;  %v973_v40 = vadd.f32 %v969_v3, %v967_v34 }
 0x73f   :  { %vm974_vm12 = vcmp.ge.f32.partialorder %v970_v5, 0.0  ;;  %v978_v8 = vmul.f32 0.2, %v970_v5  ;;  %vm976_vm13 = vcmp.ge.f32.partialorder %v972_v6, 0.0  ;;  %v980_v9 = vmul.f32 0.2, %v972_v6 }
 0x740   :  { %v979_v11 = vmul.f32 0.2, %v971_v7  ;;  %vm975_vm14 = vcmp.ge.f32.partialorder %v971_v7, 0.0  ;;  %v981_v42 = vmul.f32 0.2, %v973_v40  ;;  %vm977_vm2 = vcmp.ge.f32.partialorder %v973_v40, 0.0 }
 0x741   :  { %v982_v4 = vsel %vm974_vm12, %v970_v5, %v978_v8  ;;  %v984_v10 = vsel %vm976_vm13, %v972_v6, %v980_v9 }
 0x742   :  { %v986_v12 = vadd.f32 %v1828_v60, %v982_v4  ;;  %v2124_v14 = vadd.f32 %v1829_v13, %v984_v10  ;;  %v983_v18 = vsel %vm975_vm14, %v971_v7, %v979_v11  ;;  %v985_v29 = vsel %vm977_vm2, %v973_v40, %v981_v42 }
 0x743   :  { %v987_v20 = vadd.f32 %v1830_v19, %v983_v18  ;;  %v989_v46 = vadd.f32 %v1831_v45, %v985_v29 }
 0x744   :  { %v990_v15 = vsel %vm150_vm3, %v986_v12, -inf  ;;  %v996_v16 = vsel %vm150_vm3, %v2124_v14, -inf }
 0x745   :  { %991 = vmax.xlane.f32.xlu0 %v990_v15  ;;  %997 = vmax.xlane.f32.xlu1 %v996_v16  ;;  %v993_v21 = vsel %vm150_vm3, %v987_v20, -inf  ;;  %v999_v51 = vsel %vm150_vm3, %v989_v46, -inf }
 0x74d   :  { %994 = vmax.xlane.f32.xlu0 %v993_v21  ;;  %v1095_v22 = vpop.trf.xlu1 }
 0x74e   :  { %v1127_v23 = vperm.slane %v1095_v22, 0 }
 0x750   :  { %v1129_v24 = vadd.f32 %v1127_v23, %v1117_v0  ;;  %v1128_v25 = vadd.f32 %v1127_v23, %v1113_v56  ;;  %v1130_v26 = vadd.f32 %v1127_v23, %v1121_v17  ;;  %v1131_v62 = vadd.f32 %v1127_v23, %v1125_v43 }
 0x752   :  { %vm1133_vm15 = vcmp.ge.f32.partialorder %v1129_v24, 0.0  ;;  %v1137_v27 = vmul.f32 0.2, %v1129_v24  ;;  %vm1132_vm0 = vcmp.ge.f32.partialorder %v1128_v25, 0.0  ;;  %v1136_v30 = vmul.f32 0.2, %v1128_v25 }
 0x753   :  { %v1138_v33 = vmul.f32 0.2, %v1130_v26  ;;  %vm1134_vm1 = vcmp.ge.f32.partialorder %v1130_v26, 0.0  ;;  %v1139_v50 = vmul.f32 0.2, %v1131_v62  ;;  %vm1135_vm4 = vcmp.ge.f32.partialorder %v1131_v62, 0.0 }
 0x754   :  { %v1141_v31 = vsel %vm1133_vm15, %v1129_v24, %v1137_v27  ;;  %v1140_v32 = vsel %vm1132_vm0, %v1128_v25, %v1136_v30 }
 0x755   :  { %v1145_v35 = vadd.f32 %v1830_v19, %v1141_v31  ;;  %v1144_v36 = vadd.f32 %v1828_v60, %v1140_v32  ;;  %v1142_v39 = vsel %vm1134_vm1, %v1130_v26, %v1138_v33  ;;  %v1143_v52 = vsel %vm1135_vm4, %v1131_v62, %v1139_v50  ;;  %v2178_v50 = vld [vmem:[%s2324_s2 + $0xb0] ss:$0 sm:$0xff] }
 0x756   :  { %v1146_v41 = vadd.f32 %v1829_v13, %v1142_v39  ;;  %v1147_v53 = vadd.f32 %v1831_v45, %v1143_v52 }
 0x757   :  { %v1151_v37 = vsel %vm150_vm3, %v1145_v35, -inf  ;;  %v1148_v38 = vsel %vm150_vm3, %v1144_v36, -inf }
 0x758   :  { %1152 = vmax.xlane.f32.xlu0 %v1151_v37  ;;  %1149 = vmax.xlane.f32.xlu2 %v1148_v38  ;;  %v1154_v44 = vsel %vm150_vm3, %v1146_v41, -inf }
 0x75e   :  { %1244 = vrot.lane.b32.xlu1 %v2092_v47, %s1844_s6  ;;  %v1157_v47 = vsel %vm150_vm3, %v1147_v53, -inf }
 0x760   :  { %1155 = vmax.xlane.f32.xlu0 %v1154_v44 }
 0x768   :  { %1000 = vmax.xlane.f32.xlu0 %v999_v51 }
 0x770   :  { %1248 = vrot.lane.b32.xlu2 %v2102_v49, %s1844_s6  ;;  %1158 = vmax.xlane.f32.xlu0 %v1157_v47 }
 0x784   :  { %1246 = vrot.lane.b32.xlu0 %v2098_v48, %s1844_s6 }
 0x7b8   :  { %v992_v54 = vpop.xlane.xlu0 %991  ;;  %v998_v63 = vpop.xlane.xlu1 %997 }
 0x7b9   :  { %v1002_v56 = vsub.f32 %v986_v12, %v992_v54  ;;  %v1004_v1 = vsub.f32 %v2124_v14, %v998_v63 }
 0x7bb   :  { %v1006_v57 = vmul.f32 1.442695, %v1002_v56  ;;  %v1010_v2 = vmul.f32 1.442695, %v1004_v1 }
 0x7bd   :  { %1780 = vpow2.f32 %v1006_v57 }
 0x7c0   :  { %v995_v59 = vpop.xlane.xlu0 %994 }
 0x7c1   :  { %v1003_v61 = vsub.f32 %v987_v20, %v995_v59 }
 0x7c3   :  { %v1008_v55 = vmul.f32 1.442695, %v1003_v61  ;;  %v1781_v0 = vpop.eup %1780 }
 0x7c4   :  { %1652 = vmatmul.msk.f32.vlgmr.msra.gmra.mxu3 %vm150_vm3, %v1781_v0  ;;  %v1014_v30 = vsel %vm150_vm3, %v1781_v0, 0.0 }
 0x7c5   :  { %1782 = vpow2.f32 %v1008_v55 }
 0x7c6   :  { %1784 = vpow2.f32 %v1010_v2 }
 0x7cb   :  { %v1783_v49 = vpop.eup %1782  ;;  %v1150_v3 = vpop.xlane.xlu2 %1149 }
 0x7cc   :  { %v1153_v5 = vpop.xlane.xlu0 %1152  ;;  %v1160_v6 = vsub.f32 %v1144_v36, %v1150_v3  ;;  %1653 = vmatmul.msk.f32.gmra.mxu3 %vm150_vm3, %v1783_v49  ;;  %v1785_v9 = vpop.eup %1784  ;;  %v1017_v26 = vsel %vm150_vm3, %v1783_v49, 0.0 }
 0x7cd   :  { %v1161_v7 = vsub.f32 %v1145_v35, %v1153_v5  ;;  %v1020_v24 = vsel %vm150_vm3, %v1785_v9, 0.0 }
 0x7ce   :  { %v1164_v48 = vmul.f32 1.442695, %v1160_v6 }
 0x7cf   :  { %v1166_v4 = vmul.f32 1.442695, %v1161_v7 }
 0x7d0   :  { %1786 = vpow2.f32 %v1164_v48 }
 0x7d1   :  { %1788 = vpow2.f32 %v1166_v4 }
 0x7d4   :  { %v1156_v8 = vpop.xlane.xlu0 %1155  ;;  %1654 = vmatmul.msk.f32.gmra.mxu3 %vm150_vm3, %v1785_v9 }
 0x7d5   :  { %v1162_v11 = vsub.f32 %v1146_v41, %v1156_v8 }
 0x7d6   :  { %v1787_v10 = vpop.eup %1786 }
 0x7d7   :  { %1656 = vmatmul.msk.f32.vlgmr.msra.gmra.mxu0 %vm150_vm3, %v1787_v10  ;;  %v1168_v60 = vmul.f32 1.442695, %v1162_v11  ;;  %v1789_v14 = vpop.eup %1788  ;;  %v1172_v31 = vsel %vm150_vm3, %v1787_v10, 0.0 }
 0x7d8   :  { %v1175_v27 = vsel %vm150_vm3, %v1789_v14, 0.0 }
 0x7d9   :  { %1790 = vpow2.f32 %v1168_v60 }
 0x7dc   :  { %v1001_v12 = vpop.xlane.xlu0 %1000 }
 0x7dd   :  { %v1005_v13 = vsub.f32 %v989_v46, %v1001_v12  ;;  %v1249_v46 = vpop.permute.xlu2 %1248 }
 0x7df   :  { %v1012_v15 = vmul.f32 1.442695, %v1005_v13  ;;  %1657 = vmatmul.msk.f32.gmra.mxu0 %vm150_vm3, %v1789_v14  ;;  %v1791_v18 = vpop.eup %1790 }
 0x7e0   :  { %v1178_v25 = vsel %vm150_vm3, %v1791_v18, 0.0 }
 0x7e1   :  { %1792 = vpow2.f32 %v1012_v15  ;;  %v1245_v15 = vpop.permute.xlu1 %1244 }
 0x7e4   :  { %v1159_v16 = vpop.xlane.xlu0 %1158 }
 0x7e5   :  { %v1163_v17 = vsub.f32 %v1147_v53, %v1159_v16 }
 0x7e7   :  { %v1793_v19 = vpop.eup %1792  ;;  %v1170_v20 = vmul.f32 1.442695, %v1163_v17  ;;  %1658 = vmatmul.msk.f32.gmra.mxu0 %vm150_vm3, %v1791_v18 }
 0x7e8   :  { %1655 = vmatmul.msk.f32.gmra.mxu3 %vm150_vm3, %v1793_v19  ;;  %v1023_v21 = vsel %vm150_vm3, %v1793_v19, 0.0 }
 0x7e9   :  { %1794 = vpow2.f32 %v1170_v20  ;;  %1024 = vadd.xlane.f32.xlu0 %v1023_v21 }
 0x7ef   :  { %v1795_v22 = vpop.eup %1794 }
 0x7f0   :  { %1659 = vmatmul.msk.f32.gmra.mxu0 %vm150_vm3, %v1795_v22  ;;  %v1181_v23 = vsel %vm150_vm3, %v1795_v22, 0.0 }
 0x7f1   :  { %1182 = vadd.xlane.f32.xlu0 %v1181_v23 }
 0x7f6   :  { %v1247_v33 = vpop.permute.xlu0 %1246 }
 0x7f9   :  { %1021 = vadd.xlane.f32.xlu0 %v1020_v24 }
 0x801   :  { %1179 = vadd.xlane.f32.xlu0 %v1178_v25 }
 0x809   :  { %1018 = vadd.xlane.f32.xlu0 %v1017_v26 }
 0x811   :  { %1176 = vadd.xlane.f32.xlu0 %v1175_v27 }
 0x819   :  { %1015 = vadd.xlane.f32.xlu0 %v1014_v30 }
 0x821   :  { %1173 = vadd.xlane.f32.xlu0 %v1172_v31 }
 0x835   :  { %1242 = vrot.lane.b32.xlu0 %v2086_v28, %s1844_s6 }
 0x847   :  { %v1055_v32 = vpop.f32.mrf.mxu3 }
 0x84f   :  { %v1058_v36 = vpop.f32.mrf.mxu3 }
 0x854   :  { %v1213_v34 = vpop.f32.mrf.mxu0 }
 0x855   :  { %v2169_v35 = vsel %vm1225_vm5, %v1055_v32, %v1213_v34 }
 0x857   :  { %v1061_v40 = vpop.f32.mrf.mxu3 }
 0x85c   :  { %v1025_v37 = vpop.xlane.xlu0 %1024  ;;  %v1216_v38 = vpop.f32.mrf.mxu0 }
 0x85d   :  { %v1227_v4 = vsel %vm1225_vm5, %v1058_v36, %v1216_v38 }
 0x864   :  { %v1183_v39 = vpop.xlane.xlu0 %1182  ;;  %v1219_v42 = vpop.f32.mrf.mxu0 }
 0x865   :  { %v1233_v41 = vsel %vm1225_vm5, %v1025_v37, %v1183_v39  ;;  %v1228_v59 = vsel %vm1225_vm5, %v1061_v40, %v1219_v42 }
 0x866   :  { %1796 = vrcp.f32 %v1233_v41 }
 0x86b   :  { %v1064_v43 = vpop.f32.mrf.mxu3 }
 0x86c   :  { %v1022_v28 = vpop.xlane.xlu0 %1021  ;;  %v1797_v29 = vpop.eup %1796 }
 0x86d   :  { %v1222_v44 = vpop.f32.mrf.mxu0 }
 0x86e   :  { %v1229_v62 = vsel %vm1225_vm5, %v1064_v43, %v1222_v44 }
 0x86f   :  { %v1241_v45 = vmul.f32 %v1797_v29, %v1229_v62 }
 0x871   :  { %v1257_v51 = vadd.f32 %v1249_v46, %v1241_v45 }
 0x873   :  { %v1262_v52 = vadd.f32 %v2178_v50, %v1257_v51 }
 0x874   :  { %v1180_v53 = vpop.xlane.xlu0 %1179 }
 0x875   :  { %v1266_v47 = vsub.f32 0.0, %v1262_v52  ;;  %v1232_v54 = vsel %vm1225_vm5, %v1022_v28, %v1180_v53 }
 0x876   :  { %1798 = vrcp.f32 %v1232_v54 }
 0x877   :  { %v1273_v56 = vmul.f32 1.442695, %v1266_v47 }
 0x879   :  { %1800 = vpow2.f32 %v1273_v56 }
 0x87c   :  { %v1799_v57 = vpop.eup %1798  ;;  %v1019_v61 = vpop.xlane.xlu0 %1018 }
 0x87d   :  { %v1240_v63 = vmul.f32 %v1799_v57, %v1228_v59 }
 0x87f   :  { %v1801_v55 = vpop.eup %1800  ;;  %v1256_v0 = vadd.f32 %v1247_v33, %v1240_v63 }
 0x880   :  { %v1278_v1 = vadd.f32 1.0, %v1801_v55 }
 0x881   :  { %v1261_v2 = vadd.f32 %v2178_v50, %v1256_v0 }
 0x882   :  { %1802 = vrcp.f32 %v1278_v1  ;;  %v1335_v10 = vand.u32 2147483648, %v1278_v1  ;;  %v1333_v14 = vand.u32 2147483647, %v1278_v1  ;;  %vm1329_vm7 = vweird.f32 %v1278_v1 }
 0x883   :  { %v1265_v49 = vsub.f32 0.0, %v1261_v2 }
 0x884   :  { %v1177_v3 = vpop.xlane.xlu0 %1176  ;;  %v1336_v19 = vor.u32 1.1754944e-38, %v1335_v10  ;;  %vm1334_vm9 = vcmp.eq.f32.partialorder %v1333_v14, 8.507059e+37  ;;  %v1847_v10 = vmov 3  }
 0x885   :  { %v1271_v5 = vmul.f32 1.442695, %v1265_v49  ;;  %v1231_v6 = vsel %vm1225_vm5, %v1019_v61, %v1177_v3 }
 0x886   :  { %1804 = vrcp.f32 %v1231_v6 }
 0x887   :  { %1806 = vpow2.f32 %v1271_v5 }
 0x888   :  { %v1803_v48 = vpop.eup %1802 }
 0x889   :  { %v1325_v7 = vmul.f32 %v1803_v48, %v1278_v1  ;;  %vm1330_vm6 = vweird.f32 %v1803_v48 }
 0x88a   :  { %vm1331_vm8 = vmor %vm1329_vm7, %vm1330_vm6 }
 0x88b   :  { %v1326_v8 = vsub.f32 1.0, %v1325_v7 }
 0x88c   :  { %v1805_v9 = vpop.eup %1804  ;;  %v1016_v12 = vpop.xlane.xlu0 %1015 }
 0x88d   :  { %v1807_v11 = vpop.eup %1806  ;;  %v1239_v60 = vmul.f32 %v1805_v9, %v1227_v4  ;;  %v1327_v13 = vmul.f32 %v1803_v48, %v1326_v8 }
 0x88e   :  { %v1277_v16 = vadd.f32 1.0, %v1807_v11  ;;  %v1848_v11 = vmov 1  }
 0x88f   :  { %v1255_v17 = vadd.f32 %v1245_v15, %v1239_v60  ;;  %v1328_v18 = vadd.f32 %v1803_v48, %v1327_v13  ;;  %1701 = vset.pattern.permute.xlu1 %v1848_v11  ;;  %v1849_v60 = vmov 2  }
 0x890   :  { %1808 = vrcp.f32 %v1277_v16  ;;  %v1320_v32 = vand.u32 2147483648, %v1277_v16  ;;  %v1318_v34 = vand.u32 2147483647, %v1277_v16  ;;  %vm1314_vm10 = vweird.f32 %v1277_v16 }
 0x891   :  { %v1260_v20 = vadd.f32 %v2178_v50, %v1255_v17  ;;  %v1332_v21 = vsel %vm1331_vm8, %v1803_v48, %v1328_v18  ;;  %v1846_v48 = vmov 0  }
 0x892   :  { %v2191_v22 = vsel %vm1334_vm9, %v1336_v19, %v1332_v21  ;;  %v1321_v39 = vor.u32 1.1754944e-38, %v1320_v32  ;;  %vm1319_vm13 = vcmp.eq.f32.partialorder %v1318_v34, 8.507059e+37  ;;  %1702 = vset.pattern.permute.xlu0 %v1846_v48  ;;  %1700 = vset.pattern.permute.xlu2 %v1846_v48  ;;  %v1366_v32 = vld [vmem:[%s2324_s2 + $0x118] sm:$0xff] }
 0x893   :  { %v1264_v23 = vsub.f32 0.0, %v1260_v20  ;;  %1349 = vrot.lane.b32.xlu2 %v2191_v22, %s1845_s10 }
 0x894   :  { %v1174_v26 = vpop.xlane.xlu0 %1173 }
 0x895   :  { %v1269_v24 = vmul.f32 1.442695, %v1264_v23  ;;  %v1230_v31 = vsel %vm1225_vm5, %v1016_v12, %v1174_v26  ;;  %v1361_v26 = vld [vmem:[%s2324_s2 + $0xf0] sm:$0xff] }
 0x896   :  { %v1809_v25 = vpop.eup %1808 }
 0x897   :  { %1810 = vpow2.f32 %v1269_v24  ;;  %v1310_v27 = vmul.f32 %v1809_v25, %v1277_v16  ;;  %vm1315_vm11 = vweird.f32 %v1809_v25  ;;  %v1516_v24 = vld [vmem:[%s2324_s2 + $0xd0] ss:$0 sm:$0xff] }
 0x898   :  { %1812 = vrcp.f32 %v1230_v31  ;;  %vm1316_vm12 = vmor %vm1314_vm10, %vm1315_vm11  ;;  %v1365_v31 = vld [vmem:[%s2324_s2 + $0x110] sm:$0xff] }
 0x899   :  { %v1311_v30 = vsub.f32 1.0, %v1310_v27  ;;  %v1362_v27 = vld [vmem:[%s2324_s2 + $0xf8] sm:$0xff] }
 0x89b   :  { %v1312_v33 = vmul.f32 %v1809_v25, %v1311_v30 }
 0x89d   :  { %v1811_v36 = vpop.eup %1810  ;;  %v1313_v37 = vadd.f32 %v1809_v25, %v1312_v33  ;;  %v1481_v33 = vld [vmem:[%s2324_s2 + $0x1d0] sm:$0xff] }
 0x89e   :  { %v1276_v38 = vadd.f32 1.0, %v1811_v36  ;;  %v1813_v58 = vpop.eup %1812  ;;  %v1482_v36 = vld [vmem:[%s2324_s2 + $0x1d8] sm:$0xff] }
 0x89f   :  { %v1317_v40 = vsel %vm1316_vm12, %v1809_v25, %v1313_v37  ;;  %v1238_v28 = vmul.f32 %v1813_v58, %v2169_v35  ;;  %v1359_v37 = vld [vmem:[%s2324_s2 + $0xe0] sm:$0xff]  ;;  %v1402_v58 = vld [vmem:[%s2324_s2 + $0x158] sm:$0xff]  ;;  %vm1606_vm12 = vcmask 1041408  }
 0x8a0   :  { %1814 = vrcp.f32 %v1276_v38  ;;  %v2197_v41 = vsel %vm1319_vm13, %v1321_v39, %v1317_v40  ;;  %v1305_v46 = vand.u32 2147483648, %v1276_v38  ;;  %v1303_v52 = vand.u32 2147483647, %v1276_v38  ;;  %v1397_v40 = vld [vmem:[%s2324_s2 + $0x130] sm:$0xff] }
 0x8a1   :  { %1347 = vrot.lane.b32.xlu0 %v2197_v41, %s1845_s10  ;;  %vm1299_vm15 = vweird.f32 %v1276_v38  ;;  %vm1609_vm13 = vcmask 125954  }
 0x8a2   :  { %v1306_v56 = vor.u32 1.1754944e-38, %v1305_v46  ;;  %vm1304_vm1 = vcmp.eq.f32.partialorder %v1303_v52, 8.507059e+37  ;;  %v1437_v46 = vld [vmem:[%s2324_s2 + $0x170] sm:$0xff]  ;;  %v1399_v52 = vld [vmem:[%s2324_s2 + $0x140] sm:$0xff] }
 0x8a6   :  { %v1815_v42 = vpop.eup %1814 }
 0x8a7   :  { %v1243_v43 = vpop.permute.xlu0 %1242  ;;  %v1295_v44 = vmul.f32 %v1815_v42, %v1276_v38  ;;  %vm1300_vm14 = vweird.f32 %v1815_v42  ;;  %v1360_v38 = vld [vmem:[%s2324_s2 + $0xe8] sm:$0xff] }
 0x8a8   :  { %v1254_v29 = vadd.f32 %v1243_v43, %v1238_v28  ;;  %vm1301_vm0 = vmor %vm1299_vm15, %vm1300_vm14  ;;  %v1363_v28 = vld [vmem:[%s2324_s2 + $0x100] sm:$0xff]  ;;  %v1364_v43 = vld [vmem:[%s2324_s2 + $0x108] sm:$0xff] }
 0x8a9   :  { %v1296_v62 = vsub.f32 1.0, %v1295_v44 }
 0x8aa   :  { %v1259_v45 = vadd.f32 %v2178_v50, %v1254_v29 }
 0x8ab   :  { %v1297_v51 = vmul.f32 %v1815_v42, %v1296_v62 }
 0x8ac   :  { %v1263_v53 = vsub.f32 0.0, %v1259_v45 }
 0x8ad   :  { %v1298_v47 = vadd.f32 %v1815_v42, %v1297_v51  ;;  %v1438_v51 = vld [vmem:[%s2324_s2 + $0x178] sm:$0xff] }
 0x8ae   :  { %v1267_v54 = vmul.f32 1.442695, %v1263_v53 }
 0x8af   :  { %v1302_v57 = vsel %vm1301_vm0, %v1815_v42, %v1298_v47  ;;  %v1398_v42 = vld [vmem:[%s2324_s2 + $0x138] sm:$0xff]  ;;  %vm1610_vm0 = vmor %vm1609_vm13, %vm1606_vm12 }
 0x8b0   :  { %1816 = vpow2.f32 %v1267_v54  ;;  %v1307_v35 = vsel %vm1304_vm1, %v1306_v56, %v1302_v57  ;;  %v1400_v54 = vld [vmem:[%s2324_s2 + $0x148] sm:$0xff] }
 0x8b1   :  { %1345 = vrot.lane.b32.xlu2 %v1307_v35, %s1845_s10 }
 0x8b6   :  { %v1817_v59 = vpop.eup %1816 }
 0x8b7   :  { %v1275_v61 = vadd.f32 1.0, %v1817_v59  ;;  %v1440_v59 = vld [vmem:[%s2324_s2 + $0x188] sm:$0xff] }
 0x8b9   :  { %1818 = vrcp.f32 %v1275_v61  ;;  %v1290_v0 = vand.u32 2147483648, %v1275_v61  ;;  %v1288_v2 = vand.u32 2147483647, %v1275_v61  ;;  %vm1284_vm4 = vweird.f32 %v1275_v61 }
 0x8bb   :  { %v1291_v3 = vor.u32 1.1754944e-38, %v1290_v0  ;;  %vm1289_vm6 = vcmp.eq.f32.partialorder %v1288_v2, 8.507059e+37  ;;  %v1441_v0 = vld [vmem:[%s2324_s2 + $0x190] sm:$0xff] }
 0x8bf   :  { %v1819_v50 = vpop.eup %1818 }
 0x8c0   :  { %v1280_v63 = vmul.f32 %v1819_v50, %v1275_v61  ;;  %vm1285_vm2 = vweird.f32 %v1819_v50 }
 0x8c1   :  { %vm1286_vm5 = vmor %vm1284_vm4, %vm1285_vm2 }
 0x8c2   :  { %v1281_v55 = vsub.f32 1.0, %v1280_v63 }
 0x8c4   :  { %v1282_v1 = vmul.f32 %v1819_v50, %v1281_v55 }
 0x8c6   :  { %v1283_v49 = vadd.f32 %v1819_v50, %v1282_v1  ;;  %v1442_v1 = vld [vmem:[%s2324_s2 + $0x198] sm:$0xff] }
 0x8c8   :  { %v1287_v5 = vsel %vm1286_vm5, %v1819_v50, %v1283_v49 }
 0x8c9   :  { %v1292_v6 = vsel %vm1289_vm6, %v1291_v3, %v1287_v5 }
 0x8ca   :  { %1343 = vrot.lane.b32.xlu1 %v1292_v6, %s1845_s10 }
 0x8ed   :  { %v1350_v7 = vpop.permute.xlu2 %1349 }
 0x8ee   :  { %v1358_v4 = vadd.f32 %v1350_v7, %v2191_v22 }
 0x90b   :  { %v1346_v8 = vpop.permute.xlu2 %1345 }
 0x90c   :  { %v1356_v9 = vadd.f32 %v1346_v8, %v1307_v35  ;;  %v1439_v35 = vld [vmem:[%s2324_s2 + $0x180] sm:$0xff] }
 0x90e   :  { %1374 = vperm.xlu0 %1702, %v1356_v9  }
 0x913   :  { %v1348_v14 = vpop.permute.xlu0 %1347 }
 0x914   :  { %v1357_v15 = vadd.f32 %v1348_v14, %v2197_v41  ;;  %v1401_v41 = vld [vmem:[%s2324_s2 + $0x150] sm:$0xff] }
 0x916   :  { %1384 = vperm.xlu0 %1702, %v1358_v4  }
 0x91e   :  { %1710 = vset.pattern.permute.xlu0 %v1847_v10 }
 0x91f   :  { %1496 = vperm.xlu0 %1710, %v1358_v4  }
 0x927   :  { %1711 = vset.pattern.permute.xlu0 %v1849_v60 }
 0x93c   :  { %v1344_v12 = vpop.permute.xlu1 %1343 }
 0x93d   :  { %v1355_v13 = vadd.f32 %v1344_v12, %v1292_v6  ;;  %v1395_v6 = vld [vmem:[%s2324_s2 + $0x120] sm:$0xff] }
 0x93f   :  { %1404 = vperm.xlu1 %1701, %v1355_v13   ;;  %1369 = vperm.xlu2 %1700, %v1355_v13  }
 0x940   :  { %1444 = vperm.xlu0 %1711, %v1355_v13  }
 0x947   :  { %1705 = vset.pattern.permute.xlu1 %v1846_v48  ;;  %1703 = vset.pattern.permute.xlu2 %v1848_v11 }
 0x948   :  { %1379 = vperm.xlu1 %1705, %v1357_v15   ;;  %1408 = vperm.xlu2 %1703, %v1356_v9  }
 0x949   :  { %1715 = vset.pattern.permute.xlu0 %v1846_v48 }
 0x950   :  { %1707 = vset.pattern.permute.xlu1 %v1849_v60  ;;  %1704 = vset.pattern.permute.xlu2 %v1849_v60 }
 0x951   :  { %1452 = vperm.xlu1 %1707, %v1357_v15   ;;  %1448 = vperm.xlu2 %1704, %v1356_v9  }
 0x959   :  { %1708 = vset.pattern.permute.xlu1 %v1847_v10  ;;  %1706 = vset.pattern.permute.xlu2 %v1848_v11  ;;  %v1480_v11 = vld [vmem:[%s2324_s2 + $0x1c8] sm:$0xff] }
 0x95a   :  { %1492 = vperm.xlu1 %1708, %v1357_v15   ;;  %1412 = vperm.xlu2 %1706, %v1357_v15  }
 0x962   :  { %1709 = vset.pattern.permute.xlu1 %v1849_v60  ;;  %1416 = vperm.xlu2 %1706, %v1358_v4  }
 0x963   :  { %1456 = vperm.xlu1 %1709, %v1358_v4  }
 0x96a   :  { %1712 = vset.pattern.permute.xlu2 %v1847_v10 }
 0x96b   :  { %1713 = vset.pattern.permute.xlu1 %v1847_v10  ;;  %1488 = vperm.xlu2 %1712, %v1356_v9   ;;  %v1479_v10 = vld [vmem:[%s2324_s2 + $0x1c0] sm:$0xff] }
 0x96c   :  { %1484 = vperm.xlu1 %1713, %v1355_v13  }
 0x973   :  { %1714 = vset.pattern.permute.xlu2 %v1846_v48  ;;  %v1396_v48 = vld [vmem:[%s2324_s2 + $0x128] sm:$0xff] }
 0x974   :  { %1519 = vperm.xlu2 %1714, %v1516_v24  }
 0x980   :  { %v1375_v21 = vpop.permute.xlu0 %1374 }
 0x981   :  { %v1389_v44 = vmul.f32 %v1375_v21, %v1361_v26  ;;  %v1390_v29 = vmul.f32 %v1375_v21, %v1362_v27  ;;  %v1477_v21 = vld [vmem:[%s2324_s2 + $0x1b0] sm:$0xff] }
 0x988   :  { %v1385_v25 = vpop.permute.xlu0 %1384 }
 0x989   :  { %v1393_v62 = vmul.f32 %v1385_v25, %v1365_v31  ;;  %v1394_v45 = vmul.f32 %v1385_v25, %v1366_v32 }
 0x991   :  { %v1497_v39 = vpop.permute.xlu0 %1496 }
 0x992   :  { %v1505_v53 = vmul.f32 %v1497_v39, %v1481_v33  ;;  %v1506_v47 = vmul.f32 %v1497_v39, %v1482_v36  ;;  %v1436_v36 = vld [vmem:[%s2324_s2 + $0x168] sm:$0xff] }
 0x999   :  { %v1370_v16 = vpop.permute.xlu2 %1369 }
 0x99a   :  { %v1387_v61 = vmul.f32 %v1370_v16, %v1359_v37  ;;  %v1388_v50 = vmul.f32 %v1370_v16, %v1360_v38 }
 0x9a2   :  { %v1409_v17 = vpop.permute.xlu2 %1408 }
 0x9a3   :  { %v1421_v2 = vmul.f32 %v1409_v17, %v1397_v40  ;;  %v1422_v49 = vmul.f32 %v1409_v17, %v1398_v42 }
 0x9a5   :  { %v1429_v31 = vadd.f32 %v1421_v2, %v1389_v44  ;;  %v1430_v32 = vadd.f32 %v1422_v49, %v1390_v29  ;;  %v1475_v29 = vld [vmem:[%s2324_s2 + $0x1a0] sm:$0xff] }
 0x9ab   :  { %v1449_v19 = vpop.permute.xlu2 %1448 }
 0x9ac   :  { %v1461_v3 = vmul.f32 %v1449_v19, %v1437_v46  ;;  %v1462_v5 = vmul.f32 %v1449_v19, %v1438_v51 }
 0x9b1   :  { %v2207_v18 = vpop.permute.xlu1 %1404 }
 0x9b2   :  { %v1419_v16 = vmul.f32 %v2207_v18, %v1395_v6  ;;  %v1420_v17 = vmul.f32 %v2207_v18, %v1396_v48  ;;  %v1435_v18 = vld [vmem:[%s2324_s2 + $0x160] sm:$0xff]  ;;  %v1445_v37 = vpop.permute.xlu0 %1444 }
 0x9b3   :  { %v1460_v46 = vmul.f32 %v1445_v37, %v1436_v36 }
 0x9b4   :  { %v1413_v22 = vpop.permute.xlu2 %1412  ;;  %v1428_v42 = vadd.f32 %v1420_v17, %v1388_v50 }
 0x9b5   :  { %v1423_v7 = vmul.f32 %v1413_v22, %v1399_v52  ;;  %v1424_v8 = vmul.f32 %v1413_v22, %v1400_v54  ;;  %v1478_v22 = vld [vmem:[%s2324_s2 + $0x1b8] sm:$0xff] }
 0x9b6   :  { %v1468_v54 = vadd.f32 %v1460_v46, %v1428_v42 }
 0x9ba   :  { %v1380_v20 = vpop.permute.xlu1 %1379 }
 0x9bb   :  { %v1391_v63 = vmul.f32 %v1380_v20, %v1363_v28  ;;  %v1392_v55 = vmul.f32 %v1380_v20, %v1364_v43  ;;  %v1470_v28 = vadd.f32 %v1462_v5, %v1430_v32 }
 0x9bc   :  { %v1417_v34 = vpop.permute.xlu2 %1416 }
 0x9bd   :  { %v1425_v56 = vmul.f32 %v1417_v34, %v1401_v41  ;;  %v1426_v57 = vmul.f32 %v1417_v34, %v1402_v58  ;;  %v1431_v19 = vadd.f32 %v1423_v7, %v1391_v63  ;;  %v1432_v20 = vadd.f32 %v1424_v8, %v1392_v55 }
 0x9be   :  { %v1427_v58 = vadd.f32 %v1419_v16, %v1387_v61  ;;  %v1515_v61 = vld [vmem:[%s2324_s2 + $0xc0] sm:$0x3] }
 0x9bf   :  { %v1433_v12 = vadd.f32 %v1425_v56, %v1393_v62  ;;  %v1434_v13 = vadd.f32 %v1426_v57, %v1394_v45  ;;  %v1476_v62 = vld [vmem:[%s2324_s2 + $0x1a8] sm:$0xff]  ;;  %v1459_v45 = vmul.f32 %v1445_v37, %v1435_v18 }
 0x9c3   :  { %v1453_v23 = vpop.permute.xlu1 %1452 }
 0x9c4   :  { %v1463_v9 = vmul.f32 %v1453_v23, %v1439_v35  ;;  %v1464_v4 = vmul.f32 %v1453_v23, %v1440_v59 }
 0x9c5   :  { %v1489_v23 = vpop.permute.xlu2 %1488 }
 0x9c6   :  { %v1471_v33 = vadd.f32 %v1463_v9, %v1431_v19  ;;  %v1472_v34 = vadd.f32 %v1464_v4, %v1432_v20  ;;  %v1501_v38 = vmul.f32 %v1489_v23, %v1477_v21  ;;  %v1502_v39 = vmul.f32 %v1489_v23, %v1478_v22 }
 0x9c8   :  { %v1510_v52 = vadd.f32 %v1502_v39, %v1470_v28 }
 0x9cc   :  { %v1493_v30 = vpop.permute.xlu1 %1492 }
 0x9cd   :  { %v1503_v24 = vmul.f32 %v1493_v30, %v1479_v10  ;;  %v1504_v25 = vmul.f32 %v1493_v30, %v1480_v11  ;;  %v1469_v30 = vadd.f32 %v1461_v3, %v1429_v31 }
 0x9ce   :  { %v1520_v50 = vpop.permute.xlu2 %1519 }
 0x9cf   :  { %v1511_v43 = vadd.f32 %v1503_v24, %v1471_v33  ;;  %v1512_v44 = vadd.f32 %v1504_v25, %v1472_v34  ;;  %v1509_v51 = vadd.f32 %v1501_v38, %v1469_v30 }
 0x9d5   :  { %v1457_v60 = vpop.permute.xlu1 %1456 }
 0x9d6   :  { %v1465_v14 = vmul.f32 %v1457_v60, %v1441_v0  ;;  %v1466_v15 = vmul.f32 %v1457_v60, %v1442_v1 }
 0x9d8   :  { %v1473_v26 = vadd.f32 %v1465_v14, %v1433_v12  ;;  %v1474_v27 = vadd.f32 %v1466_v15, %v1434_v13 }
 0x9da   :  { %v1513_v40 = vadd.f32 %v1505_v53, %v1473_v26  ;;  %v1514_v41 = vadd.f32 %v1506_v47, %v1474_v27  ;;  %v1467_v47 = vadd.f32 %v1459_v45, %v1427_v58 }
 0x9dc   :  { %1537 = vmatpush.msra.mxu1 %v1513_v40  ;;  %1557 = vmatpush.msra.mxu2 %v1514_v41 }
 0x9de   :  { %v1485_v53 = vpop.permute.xlu1 %1484  ;;  %1538 = vmatpush.msra.mxu1 %v1511_v43  ;;  %1558 = vmatpush.msra.mxu2 %v1512_v44 }
 0x9df   :  { %v1499_v56 = vmul.f32 %v1485_v53, %v1475_v29  ;;  %v1500_v57 = vmul.f32 %v1485_v53, %v1476_v62 }
 0x9e0   :  { %1539 = vmatpush.msra.mxu1 %v1509_v51  ;;  %1559 = vmatpush.msra.mxu2 %v1510_v52 }
 0x9e1   :  { %v1507_v35 = vadd.f32 %v1499_v56, %v1467_v47  ;;  %v1508_v59 = vadd.f32 %v1500_v57, %v1468_v54 }
 0x9e3   :  { %1540 = vmatpush.msra.mxu1 %v1507_v35  ;;  %1560 = vmatpush.msra.mxu2 %v1508_v59 }
 0x9e4   :  { %1661 = vmatmul.msk.f32.vlgmr.msra.gmra.mxu2 %vm150_vm3, %v1515_v61  ;;  %1660 = vmatmul.msk.f32.vlgmr.msra.gmra.mxu1 %vm150_vm3, %v1515_v61 }
 0xa61   :  { %v1542_v63 = vpop.f32.mrf.mxu1 }
 0xa62   :  { %v1543_v55 = vadd.f32 %v1542_v63, %v1520_v50 }
 0xa64   :  { %v1565_v0 = vsub.f32 0.0, %v1543_v55 }
 0xa66   :  { %v1567_v1 = vmul.f32 1.442695, %v1565_v0 }
 0xa67   :  { %v1562_v2 = vpop.f32.mrf.mxu2 }
 0xa68   :  { %v1563_v49 = vadd.f32 %v1562_v2, %v1520_v50  ;;  %1820 = vpow2.f32 %v1567_v1 }
 0xa6a   :  { %v1566_v3 = vsub.f32 0.0, %v1563_v49 }
 0xa6c   :  { %v1569_v5 = vmul.f32 1.442695, %v1566_v3 }
 0xa6e   :  { %v1821_v6 = vpop.eup %1820  ;;  %1822 = vpow2.f32 %v1569_v5 }
 0xa6f   :  { %v1571_v48 = vadd.f32 1.0, %v1821_v6 }
 0xa71   :  { %1824 = vrcp.f32 %v1571_v48  ;;  %vm1578_vm3 = vweird.f32 %v1571_v48  ;;  %v1584_v19 = vand.u32 2147483648, %v1571_v48  ;;  %v1582_v22 = vand.u32 2147483647, %v1571_v48 }
 0xa73   :  { %v1585_v27 = vor.u32 1.1754944e-38, %v1584_v19  ;;  %vm1583_vm15 = vcmp.eq.f32.partialorder %v1582_v22, 8.507059e+37 }
 0xa74   :  { %v1823_v7 = vpop.eup %1822 }
 0xa75   :  { %v1572_v8 = vadd.f32 1.0, %v1823_v7 }
 0xa77   :  { %v1825_v9 = vpop.eup %1824  ;;  %1826 = vrcp.f32 %v1572_v8  ;;  %v1599_v14 = vand.u32 2147483648, %v1572_v8  ;;  %v1597_v16 = vand.u32 2147483647, %v1572_v8  ;;  %vm1593_vm9 = vweird.f32 %v1572_v8 }
 0xa78   :  { %v1574_v4 = vmul.f32 %v1825_v9, %v1571_v48  ;;  %vm1579_vm7 = vweird.f32 %v1825_v9 }
 0xa79   :  { %vm2315_vm11 = vmor %vm1578_vm3, %vm1579_vm7  ;;  %v1600_v23 = vor.u32 1.1754944e-38, %v1599_v14  ;;  %vm1598_vm14 = vcmp.eq.f32.partialorder %v1597_v16, 8.507059e+37 }
 0xa7a   :  { %v1575_v10 = vsub.f32 1.0, %v1574_v4 }
 0xa7c   :  { %v1576_v12 = vmul.f32 %v1825_v9, %v1575_v10 }
 0xa7d   :  { %v1827_v11 = vpop.eup %1826 }
 0xa7e   :  { %v1589_v60 = vmul.f32 %v1827_v11, %v1572_v8  ;;  %vm1594_vm8 = vweird.f32 %v1827_v11  ;;  %v1577_v17 = vadd.f32 %v1825_v9, %v1576_v12 }
 0xa7f   :  { %vm1595_vm10 = vmor %vm1593_vm9, %vm1594_vm8 }
 0xa80   :  { %v1590_v13 = vsub.f32 1.0, %v1589_v60  ;;  %v1581_v25 = vsel %vm2315_vm11, %v1825_v9, %v1577_v17 }
 0xa81   :  { %v1586_v32 = vsel %vm1583_vm15, %v1585_v27, %v1581_v25 }
 0xa82   :  { %v1591_v15 = vmul.f32 %v1827_v11, %v1590_v13 }
 0xa84   :  { %v1592_v20 = vadd.f32 %v1827_v11, %v1591_v15 }
 0xa86   :  { %v1596_v24 = vsel %vm1595_vm10, %v1827_v11, %v1592_v20 }
 0xa87   :  { %v1601_v26 = vsel %vm1598_vm14, %v1600_v23, %v1596_v24 }
 0xa88   :  { %v1605_v31 = vrot.slane %v1601_v26, 6 }
 0xa8a   :  { %v1607_v33 = vsel %vm1606_vm12, %v1586_v32, %v1605_v31 }
 0xa8b   :  { %1611 = vst.msk [vmem:[%s2327_s3] sm:$0xf] %vm1610_vm0, %v1607_v33 }

</bundles_post_ra>
